<compile_context>
chip_gen: v6e
topology: v6e:2x2x1
jax: 0.10.0
libtpu: 0.0.40
codegen_flags: <defaults>
</compile_context>

<pallas_src>
import jax
import jax.numpy as jnp
from jax import lax
from jax.experimental import pallas as pl
from jax.experimental.pallas import tpu as pltpu


def resblock_kernel(x_ref, boxp_ref, wvis_ref, wgeo_ref, out_ref):
    # x_ref:    (N, 512)   f32  visual features (one graph; batch dim squeezed)
    # boxp_ref: (N, 16)    f32  box features, zero-padded 4 -> 16
    # wvis_ref: (512,1536) bf16 [WK1/4 | WQ1/4 | WV1 | WK2/4 | WQ2/4 | WV2]
    # wgeo_ref: (16, 512)  bf16 [WG1/4 | WG2/4], rows 4..15 zero
    # out_ref:  (N, 512)   f32
    x = x_ref[...]
    xb = x.astype(jnp.bfloat16)
    boxb = boxp_ref[...].astype(jnp.bfloat16)

    # Two fused projection matmuls replace the original eight.
    proj = jnp.dot(xb, wvis_ref[...], preferred_element_type=jnp.float32)    # (N,1536)
    gall = jnp.dot(boxb, wgeo_ref[...], preferred_element_type=jnp.float32)  # (N, 512)

    contract_last = (((1,), (1,)), ((), ()))  # a @ b.T without an XLU transpose

    def branch(off, g):
        k = proj[:, off + 0 * 256: off + 1 * 256].astype(jnp.bfloat16)  # carries 1/4
        q = proj[:, off + 1 * 256: off + 2 * 256].astype(jnp.bfloat16)  # carries 1/4
        v = proj[:, off + 2 * 256: off + 3 * 256].astype(jnp.bfloat16)
        gb = g.astype(jnp.bfloat16)                                      # carries 1/4
        # WA = K Q^T / 16  (scale folded into K, Q)
        wa = lax.dot_general(k, q, contract_last,
                             preferred_element_type=jnp.float32)         # (N, N)
        # WG = relu(G G^T / 16)  (scale folded into G)
        wgm = jnp.maximum(
            lax.dot_general(gb, gb, contract_last,
                            preferred_element_type=jnp.float32), 0.0)    # (N, N)
        # W = WG*exp(WA) / sum(WG*exp(WA)); subtracting max(WA) folds exactly
        # into the shared denominator (stabilized exp, identical math).
        wa_max = jnp.max(wa, keepdims=True)                              # (1, 1)
        num = wgm * jnp.exp(wa - wa_max)                                 # (N, N)
        denom = jnp.sum(num, keepdims=True)                              # (1, 1)
        w = (num * pl.reciprocal(denom, approx=True)).astype(jnp.bfloat16)
        return jnp.dot(w, v, preferred_element_type=jnp.float32)         # (N, 256)

    fr1 = branch(0, gall[:, :256])
    fr2 = branch(768, gall[:, 256:])

    # Residual output, written per 256-lane half (lane-dense, no concat).
    out_ref[:, 0:256] = fr1 * 0.1 + x[:, 0:256]
    out_ref[:, 256:512] = fr2 * 0.1 + x[:, 256:512]


def fuse_params(params):
    """One-time weight prep (hoisted out of the per-call path).

    Folds the 1/16 affinity scales (WK, WQ, WG each *0.25 -- exact in bf16),
    fuses the six visual projections into one (512, 1536) bf16 matrix and the
    two geometry projections into one (16, 512) bf16 matrix (rows 4..15 zero,
    bf16 sublane tile).
    """
    w_vis = jnp.concatenate(
        [params["WK_1"] * 0.25, params["WQ_1"] * 0.25, params["WV_1"],
         params["WK_2"] * 0.25, params["WQ_2"] * 0.25, params["WV_2"]],
        axis=1).astype(jnp.bfloat16)                                   # (512, 1536)
    w_geo = jnp.concatenate(
        [params["WG_1"] * 0.25, params["WG_2"] * 0.25], axis=1)        # (4, 512)
    w_geo = jnp.pad(w_geo, ((0, 12), (0, 0))).astype(jnp.bfloat16)     # (16, 512)
    return w_vis, w_geo


@jax.jit
def resblock_forward(x, box, w_vis, w_geo):
    """x: (B, N, 512) or (N, 512) f32; box: (B, N, 4) or (N, 4) f32."""
    single = x.ndim == 2
    if single:
        x, box = x[None], box[None]
    B, N, _ = x.shape
    box_p = jnp.pad(box, ((0, 0), (0, 0), (0, 16 - box.shape[-1])))    # (B, N, 16)

    # Advisory cost for XLA scheduling around this short custom call.
    flops = B * (2 * N * 512 * 1536 + 2 * N * 16 * 512 + 2 * 3 * 2 * N * N * 256)
    transcendentals = B * 2 * N * N
    bytes_accessed = (512 * 1536 * 2 + 16 * 512 * 2          # bf16 weights (read once)
                      + 2 * B * N * 512 * 4 + B * N * 16 * 4)  # x in + out + box

    out = pl.pallas_call(
        resblock_kernel,
        out_shape=jax.ShapeDtypeStruct((B, N, 512), jnp.float32),
        grid_spec=pltpu.PrefetchScalarGridSpec(
            num_scalar_prefetch=0,
            grid=(B,),
            in_specs=[
                pl.BlockSpec((None, N, 512), lambda b: (b, 0, 0)),
                pl.BlockSpec((None, N, 16), lambda b: (b, 0, 0)),
                # Constant index_map: weight DMA issued once, block stays
                # VMEM-resident across the whole grid.
                pl.BlockSpec((512, 1536), lambda b: (0, 0)),
                pl.BlockSpec((16, 512), lambda b: (0, 0)),
            ],
            out_specs=pl.BlockSpec((None, N, 512), lambda b: (b, 0, 0)),
        ),
        compiler_params=pltpu.CompilerParams(
            dimension_semantics=("parallel",)),
        cost_estimate=pl.CostEstimate(
            flops=flops, transcendentals=transcendentals,
            bytes_accessed=bytes_accessed),
        input_output_aliases={0: 0},   # out = 0.1*FR + x, same shape/dtype as x
    )(x, box_p, w_vis, w_geo)
    return out[0] if single else out


def resblock_reference(x, box, params):
    """Pure-JAX reference mirroring the PyTorch forward exactly (f32, 1 graph)."""
    def branch(wk, wq, wv, wg):
        k = x @ wk
        q = x @ wq
        wa = (k @ q.T) / 16.0
        g = box @ wg
        wgm = jnp.maximum((g @ g.T) / 16.0, 0.0)
        num = wgm * jnp.exp(wa)
        w = num / jnp.sum(num)
        return w @ (x @ wv)

    fr1 = branch(params["WK_1"], params["WQ_1"], params["WV_1"], params["WG_1"])
    fr2 = branch(params["WK_2"], params["WQ_2"], params["WV_2"], params["WG_2"])
    fr = jnp.concatenate([fr1, fr2], axis=1)
    return fr * 0.1 + x


def init_params(key):
    """Deterministic synthetic weights; stored as (in_features, out_features)."""
    names_shapes = [
        ("WG_1", (4, 256)), ("WK_1", (512, 256)), ("WQ_1", (512, 256)), ("WV_1", (512, 256)),
        ("WG_2", (4, 256)), ("WK_2", (512, 256)), ("WQ_2", (512, 256)), ("WV_2", (512, 256)),
    ]
    params = {}
    keys = jax.random.split(key, len(names_shapes))
    for (name, shape), k in zip(names_shapes, keys):
        fan_in = shape[0]
        scale = 1.0 / jnp.sqrt(jnp.float32(fan_in))
        params[name] = jax.random.uniform(k, shape, jnp.float32, -1.0, 1.0) * scale
    return params


if __name__ == "__main__":
    key = jax.random.PRNGKey(0)
    k_x, k_box, k_p = jax.random.split(key, 3)

    B = 4   # graphs per call (batched grid axis)
    N = 8   # region proposals / graph nodes
    x = jax.random.normal(k_x, (B, N, 512), jnp.float32) * 0.1
    box = jax.random.uniform(k_box, (B, N, 4), jnp.float32)
    params = init_params(k_p)

    # Weight fusion done once at param-load time (not per forward call).
    w_vis, w_geo = fuse_params(params)

    out = jax.block_until_ready(resblock_forward(x, box, w_vis, w_geo))
    ref = jax.vmap(lambda xx, bb: resblock_reference(xx, bb, params))(x, box)

    assert out.shape == (B, N, 512)
    # Tolerance covers bf16 weight/operand storage in the kernel (f32 accum);
    # FR*0.1 is ~1e-3..1e-2 scale so the induced error is well under 1e-3 abs.
    assert jnp.allclose(out, ref, atol=2e-3, rtol=2e-3), (
        f"mismatch vs reference, max abs err = {jnp.max(jnp.abs(out - ref))}")

    print("KERNEL_OK")
</pallas_src>

<mosaic_0001>
module attributes {stable_mosaic.version = 11 : i64} {
  func.func @resblock_kernel(%arg0: i32, %arg1: memref<1x8x512xf32, #tpu.memory_space<vmem>>, %arg2: memref<1x8x16xf32, #tpu.memory_space<vmem>>, %arg3: memref<512x1536xbf16, #tpu.memory_space<vmem>>, %arg4: memref<16x512xbf16, #tpu.memory_space<vmem>>, %arg5: memref<1x8x512xf32, #tpu.memory_space<vmem>>) attributes {dimension_semantics = [#tpu.dimension_semantics<parallel>], iteration_bounds = array<i64: 4>, scalar_prefetch = 0 : i64, scratch_operands = 0 : i64, tpu.core_type = #tpu.core_type<tc>, window_params = [{transform_indices = @transform_0, window_bounds = array<i64: 1, 8, 512>}, {transform_indices = @transform_1, window_bounds = array<i64: 1, 8, 16>}, {pipeline_mode = #tpu.pipeline_mode<synchronous>, transform_indices = @transform_2, window_bounds = array<i64: 512, 1536>}, {pipeline_mode = #tpu.pipeline_mode<synchronous>, transform_indices = @transform_3, window_bounds = array<i64: 16, 512>}, {transform_indices = @transform_4, window_bounds = array<i64: 1, 8, 512>}]} {
    %c0 = arith.constant 0 : index
    %c0_0 = arith.constant 0 : index
    %c0_1 = arith.constant 0 : index
    %0 = vector.load %arg1[%c0, %c0_0, %c0_1] : memref<1x8x512xf32, #tpu.memory_space<vmem>>, vector<1x8x512xf32>
    %1 = vector.shape_cast %0 : vector<1x8x512xf32> to vector<8x512xf32>
    %2 = arith.truncf %1 : vector<8x512xf32> to vector<8x512xbf16>
    %c0_2 = arith.constant 0 : index
    %c0_3 = arith.constant 0 : index
    %c0_4 = arith.constant 0 : index
    %3 = vector.load %arg2[%c0_2, %c0_3, %c0_4] : memref<1x8x16xf32, #tpu.memory_space<vmem>>, vector<1x8x16xf32>
    %4 = vector.shape_cast %3 : vector<1x8x16xf32> to vector<8x16xf32>
    %5 = arith.truncf %4 : vector<8x16xf32> to vector<8x16xbf16>
    %c0_5 = arith.constant 0 : index
    %c0_6 = arith.constant 0 : index
    %6 = vector.load %arg3[%c0_5, %c0_6] : memref<512x1536xbf16, #tpu.memory_space<vmem>>, vector<512x1536xbf16>
    %cst = arith.constant dense<0.000000e+00> : vector<8x1536xf32>
    %7 = tpu.matmul %2, %6, %cst {dimension_numbers = #tpu.dot_dimension_numbers<[1], [0], [0], [1], [0, 0, 1, 1], [], []>} : vector<8x512xbf16>, vector<512x1536xbf16>, vector<8x1536xf32> -> vector<8x1536xf32>
    %c0_7 = arith.constant 0 : index
    %c0_8 = arith.constant 0 : index
    %8 = vector.load %arg4[%c0_7, %c0_8] : memref<16x512xbf16, #tpu.memory_space<vmem>>, vector<16x512xbf16>
    %cst_9 = arith.constant dense<0.000000e+00> : vector<8x512xf32>
    %9 = tpu.matmul %5, %8, %cst_9 {dimension_numbers = #tpu.dot_dimension_numbers<[1], [0], [0], [1], [0, 0, 1, 1], [], []>} : vector<8x16xbf16>, vector<16x512xbf16>, vector<8x512xf32> -> vector<8x512xf32>
    %10 = vector.extract_strided_slice %9 {offsets = [0, 0], sizes = [8, 256], strides = [1, 1]} : vector<8x512xf32> to vector<8x256xf32>
    %11 = vector.extract_strided_slice %7 {offsets = [0, 0], sizes = [8, 256], strides = [1, 1]} : vector<8x1536xf32> to vector<8x256xf32>
    %12 = arith.truncf %11 : vector<8x256xf32> to vector<8x256xbf16>
    %13 = vector.extract_strided_slice %7 {offsets = [0, 256], sizes = [8, 256], strides = [1, 1]} : vector<8x1536xf32> to vector<8x256xf32>
    %14 = arith.truncf %13 : vector<8x256xf32> to vector<8x256xbf16>
    %15 = vector.extract_strided_slice %7 {offsets = [0, 512], sizes = [8, 256], strides = [1, 1]} : vector<8x1536xf32> to vector<8x256xf32>
    %16 = arith.truncf %15 : vector<8x256xf32> to vector<8x256xbf16>
    %17 = arith.truncf %10 : vector<8x256xf32> to vector<8x256xbf16>
    %cst_10 = arith.constant dense<0.000000e+00> : vector<8x8xf32>
    %18 = tpu.matmul %12, %14, %cst_10 {dimension_numbers = #tpu.dot_dimension_numbers<[1], [1], [0], [0], [0, 0, 1, 0], [], []>} : vector<8x256xbf16>, vector<8x256xbf16>, vector<8x8xf32> -> vector<8x8xf32>
    %cst_11 = arith.constant dense<0.000000e+00> : vector<8x8xf32>
    %19 = tpu.matmul %17, %17, %cst_11 {dimension_numbers = #tpu.dot_dimension_numbers<[1], [1], [0], [0], [0, 0, 1, 0], [], []>} : vector<8x256xbf16>, vector<8x256xbf16>, vector<8x8xf32> -> vector<8x8xf32>
    %cst_12 = arith.constant 0.000000e+00 : f32
    %20 = vector.broadcast %cst_12 : f32 to vector<8x8xf32>
    %21 = arith.maximumf %19, %20 : vector<8x8xf32>
    %22 = vector.shape_cast %18 : vector<8x8xf32> to vector<1x8x8xf32>
    %cst_13 = arith.constant dense<0xFF800000> : vector<1xf32>
    %23 = vector.multi_reduction <maximumf>, %22, %cst_13 [1, 2] : vector<1x8x8xf32> to vector<1xf32>
    %24 = vector.shape_cast %23 : vector<1xf32> to vector<1x1x1xf32>
    %25 = vector.extract %24[0, 0, 0] : f32 from vector<1x1x1xf32>
    %26 = vector.broadcast %25 : f32 to vector<1x1xf32>
    %27 = vector.broadcast %26 : vector<1x1xf32> to vector<8x8xf32>
    %28 = arith.subf %18, %27 : vector<8x8xf32>
    %29 = math.exp %28 : vector<8x8xf32>
    %30 = arith.mulf %21, %29 : vector<8x8xf32>
    %31 = vector.shape_cast %30 : vector<8x8xf32> to vector<1x8x8xf32>
    %cst_14 = arith.constant dense<0.000000e+00> : vector<1xf32>
    %32 = vector.multi_reduction <add>, %31, %cst_14 [1, 2] : vector<1x8x8xf32> to vector<1xf32>
    %33 = vector.shape_cast %32 : vector<1xf32> to vector<1x1x1xf32>
    %34 = vector.extract %33[0, 0, 0] : f32 from vector<1x1x1xf32>
    %35 = vector.broadcast %34 : f32 to vector<1x1xf32>
    %36 = tpu.reciprocal %35 {approx = true} : vector<1x1xf32> -> vector<1x1xf32>
    %37 = vector.broadcast %36 : vector<1x1xf32> to vector<8x8xf32>
    %38 = arith.mulf %30, %37 : vector<8x8xf32>
    %39 = arith.truncf %38 : vector<8x8xf32> to vector<8x8xbf16>
    %cst_15 = arith.constant dense<0.000000e+00> : vector<8x256xf32>
    %40 = tpu.matmul %39, %16, %cst_15 {dimension_numbers = #tpu.dot_dimension_numbers<[1], [0], [0], [1], [0, 0, 1, 1], [], []>} : vector<8x8xbf16>, vector<8x256xbf16>, vector<8x256xf32> -> vector<8x256xf32>
    %41 = vector.extract_strided_slice %9 {offsets = [0, 256], sizes = [8, 256], strides = [1, 1]} : vector<8x512xf32> to vector<8x256xf32>
    %42 = vector.extract_strided_slice %7 {offsets = [0, 768], sizes = [8, 256], strides = [1, 1]} : vector<8x1536xf32> to vector<8x256xf32>
    %43 = arith.truncf %42 : vector<8x256xf32> to vector<8x256xbf16>
    %44 = vector.extract_strided_slice %7 {offsets = [0, 1024], sizes = [8, 256], strides = [1, 1]} : vector<8x1536xf32> to vector<8x256xf32>
    %45 = arith.truncf %44 : vector<8x256xf32> to vector<8x256xbf16>
    %46 = vector.extract_strided_slice %7 {offsets = [0, 1280], sizes = [8, 256], strides = [1, 1]} : vector<8x1536xf32> to vector<8x256xf32>
    %47 = arith.truncf %46 : vector<8x256xf32> to vector<8x256xbf16>
    %48 = arith.truncf %41 : vector<8x256xf32> to vector<8x256xbf16>
    %cst_16 = arith.constant dense<0.000000e+00> : vector<8x8xf32>
    %49 = tpu.matmul %43, %45, %cst_16 {dimension_numbers = #tpu.dot_dimension_numbers<[1], [1], [0], [0], [0, 0, 1, 0], [], []>} : vector<8x256xbf16>, vector<8x256xbf16>, vector<8x8xf32> -> vector<8x8xf32>
    %cst_17 = arith.constant dense<0.000000e+00> : vector<8x8xf32>
    %50 = tpu.matmul %48, %48, %cst_17 {dimension_numbers = #tpu.dot_dimension_numbers<[1], [1], [0], [0], [0, 0, 1, 0], [], []>} : vector<8x256xbf16>, vector<8x256xbf16>, vector<8x8xf32> -> vector<8x8xf32>
    %cst_18 = arith.constant 0.000000e+00 : f32
    %51 = vector.broadcast %cst_18 : f32 to vector<8x8xf32>
    %52 = arith.maximumf %50, %51 : vector<8x8xf32>
    %53 = vector.shape_cast %49 : vector<8x8xf32> to vector<1x8x8xf32>
    %cst_19 = arith.constant dense<0xFF800000> : vector<1xf32>
    %54 = vector.multi_reduction <maximumf>, %53, %cst_19 [1, 2] : vector<1x8x8xf32> to vector<1xf32>
    %55 = vector.shape_cast %54 : vector<1xf32> to vector<1x1x1xf32>
    %56 = vector.extract %55[0, 0, 0] : f32 from vector<1x1x1xf32>
    %57 = vector.broadcast %56 : f32 to vector<1x1xf32>
    %58 = vector.broadcast %57 : vector<1x1xf32> to vector<8x8xf32>
    %59 = arith.subf %49, %58 : vector<8x8xf32>
    %60 = math.exp %59 : vector<8x8xf32>
    %61 = arith.mulf %52, %60 : vector<8x8xf32>
    %62 = vector.shape_cast %61 : vector<8x8xf32> to vector<1x8x8xf32>
    %cst_20 = arith.constant dense<0.000000e+00> : vector<1xf32>
    %63 = vector.multi_reduction <add>, %62, %cst_20 [1, 2] : vector<1x8x8xf32> to vector<1xf32>
    %64 = vector.shape_cast %63 : vector<1xf32> to vector<1x1x1xf32>
    %65 = vector.extract %64[0, 0, 0] : f32 from vector<1x1x1xf32>
    %66 = vector.broadcast %65 : f32 to vector<1x1xf32>
    %67 = tpu.reciprocal %66 {approx = true} : vector<1x1xf32> -> vector<1x1xf32>
    %68 = vector.broadcast %67 : vector<1x1xf32> to vector<8x8xf32>
    %69 = arith.mulf %61, %68 : vector<8x8xf32>
    %70 = arith.truncf %69 : vector<8x8xf32> to vector<8x8xbf16>
    %cst_21 = arith.constant dense<0.000000e+00> : vector<8x256xf32>
    %71 = tpu.matmul %70, %47, %cst_21 {dimension_numbers = #tpu.dot_dimension_numbers<[1], [0], [0], [1], [0, 0, 1, 1], [], []>} : vector<8x8xbf16>, vector<8x256xbf16>, vector<8x256xf32> -> vector<8x256xf32>
    %cst_22 = arith.constant 1.000000e-01 : f32
    %72 = vector.broadcast %cst_22 : f32 to vector<8x256xf32>
    %73 = arith.mulf %40, %72 : vector<8x256xf32>
    %74 = vector.extract_strided_slice %1 {offsets = [0, 0], sizes = [8, 256], strides = [1, 1]} : vector<8x512xf32> to vector<8x256xf32>
    %75 = arith.addf %73, %74 : vector<8x256xf32>
    %c0_23 = arith.constant 0 : index
    %c0_24 = arith.constant 0 : index
    %c0_25 = arith.constant 0 : index
    %76 = vector.load %arg5[%c0_23, %c0_24, %c0_25] : memref<1x8x512xf32, #tpu.memory_space<vmem>>, vector<1x8x256xf32>
    %77 = vector.shape_cast %76 : vector<1x8x256xf32> to vector<8x256xf32>
    %78 = vector.shape_cast %75 : vector<8x256xf32> to vector<1x8x256xf32>
    tpu.vector_store %arg5[%c0_23, %c0_24, %c0_25], %78 {strides = array<i32>} : memref<1x8x512xf32, #tpu.memory_space<vmem>>, vector<1x8x256xf32>,
    %cst_26 = arith.constant 1.000000e-01 : f32
    %79 = vector.broadcast %cst_26 : f32 to vector<8x256xf32>
    %80 = arith.mulf %71, %79 : vector<8x256xf32>
    %81 = vector.extract_strided_slice %1 {offsets = [0, 256], sizes = [8, 256], strides = [1, 1]} : vector<8x512xf32> to vector<8x256xf32>
    %82 = arith.addf %80, %81 : vector<8x256xf32>
    %c0_27 = arith.constant 0 : index
    %c0_28 = arith.constant 0 : index
    %c256 = arith.constant 256 : index
    %83 = vector.load %arg5[%c0_27, %c0_28, %c256] : memref<1x8x512xf32, #tpu.memory_space<vmem>>, vector<1x8x256xf32>
    %84 = vector.shape_cast %83 : vector<1x8x256xf32> to vector<8x256xf32>
    %85 = vector.shape_cast %82 : vector<8x256xf32> to vector<1x8x256xf32>
    tpu.vector_store %arg5[%c0_27, %c0_28, %c256], %85 {strides = array<i32>} : memref<1x8x512xf32, #tpu.memory_space<vmem>>, vector<1x8x256xf32>,
    return
  }
  func.func @transform_0(%arg0: i32) -> (i32, i32, i32) {
    %c0_i32 = arith.constant 0 : i32
    %c0_i32_0 = arith.constant 0 : i32
    %c0_i32_1 = arith.constant 0 : i32
    return %arg0, %c0_i32, %c0_i32_0 : i32, i32, i32
  }
  func.func @transform_1(%arg0: i32) -> (i32, i32, i32) {
    %c0_i32 = arith.constant 0 : i32
    %c0_i32_0 = arith.constant 0 : i32
    %c0_i32_1 = arith.constant 0 : i32
    return %arg0, %c0_i32, %c0_i32_0 : i32, i32, i32
  }
  func.func @transform_2(%arg0: i32) -> (i32, i32) {
    %c0_i32 = arith.constant 0 : i32
    %c0_i32_0 = arith.constant 0 : i32
    %c0_i32_1 = arith.constant 0 : i32
    return %c0_i32, %c0_i32_0 : i32, i32
  }
  func.func @transform_3(%arg0: i32) -> (i32, i32) {
    %c0_i32 = arith.constant 0 : i32
    %c0_i32_0 = arith.constant 0 : i32
    %c0_i32_1 = arith.constant 0 : i32
    return %c0_i32, %c0_i32_0 : i32, i32
  }
  func.func @transform_4(%arg0: i32) -> (i32, i32, i32) {
    %c0_i32 = arith.constant 0 : i32
    %c0_i32_0 = arith.constant 0 : i32
    %c0_i32_1 = arith.constant 0 : i32
    return %arg0, %c0_i32, %c0_i32_0 : i32, i32, i32
  }
}

</mosaic_0001>

<bundles_post_ra>
// kernel: resblock_forward.1
= control target key start
LH: loop header
LB: loop body
LE: loop exit
PB: predicated region body
PF: predicated region fallthrough
CT: control target
= control target key end

     0   :  { %9 = vsyncpa [#allocation3], 0  ;;  %s5177_s0 = inlined_call_operand.hbm [shape: f32[4,8,512], index: 0, kind: input, shape index: {}, may-alias: {0,4}]   ;;  %s5178_s1 = inlined_call_operand.vmem [shape: f32[4,8,16], index: 1, kind: input, shape index: {}]   ;;  %s5179_s2 = inlined_call_operand.hbm [shape: bf16[512,1536], index: 2, kind: input, shape index: {}]   ;;  %s5180_s3 = inlined_call_operand.hbm [shape: bf16[16,512], index: 3, kind: input, shape index: {}]   ;;  %s5181_s4 = inlined_call_operand.hbm [shape: f32[4,8,512], index: 4, kind: output, shape index: {}, may-alias: {0,4}]  }
   0x1   :  { %11 = vsyncpa [#allocation3 + $0x1], 0 }
   0x2   :  { %12 = vsyncpa [#allocation6], 0 }
   0x3   :  { %13 = vsyncpa [#allocation4], 0 }
   0x4   :  { %15 = vsyncpa [#allocation4 + $0x1], 0  ;;  %s4916_s15 = smov 0   ;;  %s4918_s16 = smov 0  }
   0x5   :  { %s4920_s17 = smov 0   ;;  %s4922_s18 = smov 0  }
   0x6 LB: > { %s4937_s19 = sadd.s32 4294967295, %s4880_s18   ;;  %s3643_s20 = sadd.s32 4294967294, %s4880_s18   ;;  %s4880_s18 = sphi %s4922_s18, %s5202_s18   ;;  %s4876_s17 = sphi %s4920_s17, %s5201_s17   ;;  %s4872_s16 = sphi %s4918_s16, %s5200_s16   ;;  %s4868_s15 = sphi %s4916_s15, %s5199_s15  }
   0x7   : > { %p41_p0 = scmp.ne.s32.totalorder %s4872_s16, %s4868_s15  ;;  %p5182_p1 = scmp.eq.s32.totalorder %s4937_s19, 0 }
   0x8   : > { %p139_p3 = scmp.eq.s32.totalorder %s3643_s20, 3  ;;  %p3644_p5 = scmp.ge.s32.totalorder %s4880_s18, 1 }
   0x9   : > { %p4946_p4 = por %p5182_p1, %p41_p0  ;;  %p146_p7 = scmp.lt.s32.totalorder %s4880_s18, 5 }
   0xa   : > { %p4951_p6 = por %p139_p3, %p41_p0  ;;  %s4882_s24 = smov [#allocation5]  }
   0xb   : > { %s5186_s21 = scalar_select %p4946_p4, 1, 0 }
   0xc   : > { %s5187_s22 = scalar_select %p4951_p6, 1, 0 }
   0xd   : > { %p4956_p8 = pnand %p3644_p5, %p146_p7  ;;  %s158_s25 = sshll.u32 %s4882_s24, 4  ;;  %s159_s25 = int_to_ptr.vmem [resolvable:$true] %s158_s25 }
   0xe   : > { %s4883_s27 = smov [#allocation7]   ;;  %s4743_s29 = scalar_lea.vmem %s159_s25, 49152 }
   0xf   : > { %s5188_s23 = scalar_select %p4956_p8, 1, 0 }
  0x10   : > { %p4078_p9 = pneg %p4956_p8  ;;  %s171_s28 = sshll.u32 %s4883_s27, 4  ;;  %s172_s28 = int_to_ptr.vmem [resolvable:$true] %s171_s28 }
  0x11   : > { %p4744_p12 = scmp.ne.s32.totalorder %s159_s25, %s4743_s29  ;;  %p4751_p3 = scmp.lt.s32.totalorder %s159_s25, %s159_s25 }
  0x12   : > { %p4964_p10 = pnand %p4078_p9, %p5182_p1  ;;  %p4752_p5 = scmp.lt.s32.totalorder %s4743_s29, %s4743_s29 }
  0x14   : > { %p4734_p11 = pneg %p4964_p10  ;;  %p4753_p7 = por %p4752_p5, %p4751_p3 }
  0x16   : > { %p4746_p13 = pnand %p4744_p12, %p4734_p11 }
  0x18   : > { %p4747_p0 = pneg %p4746_p13 }
  0x1a   : > { %p4754_p9 = pnand %p4753_p7, %p4747_p0 }
  0x1c   : > { %4757 = shalt.err (!%p4754_p9)
}
  0x1d   : > { %s4884_s30 = smov 768   ;;  %s4885_s5 = smov 48  }
  0x1e   : > { %4081 = dma.hbm_to_vmem [thread:$0]  (!%p4964_p10), %s5179_s2, 49152, %s159_s25, [#allocation6], %s4884_s30, %s4884_s30, %s4885_s5  }
  0x1f   : > { %s4769_s8 = scalar_lea.vmem %s172_s28, 512  ;;  %p4777_p2 = scmp.lt.s32.totalorder %s172_s28, %s172_s28 }
  0x20   : > { %p4770_p1 = scmp.ne.s32.totalorder %s172_s28, %s4769_s8  ;;  %p4778_p6 = scmp.lt.s32.totalorder %s4769_s8, %s4769_s8 }
  0x22   : > { %p4772_p12 = pnand %p4770_p1, %p4734_p11  ;;  %p4779_p3 = por %p4778_p6, %p4777_p2 }
  0x24   : > { %p4773_p13 = pneg %p4772_p12 }
  0x26   : > { %p4780_p0 = pnand %p4779_p3, %p4773_p13 }
  0x28   : > { %4783 = shalt.err (!%p4780_p0)
}
  0x29   : > { %s4886_s9 = smov 256   ;;  %s4887_s10 = smov 16  }
  0x2a   : > { %4084 = dma.hbm_to_vmem [thread:$0]  (!%p4964_p10), %s5180_s3, 512, %s172_s28, [#allocation6], %s4886_s9, %s4886_s9, %s4887_s10  }
  0x2b   : > { %s4987_s13 = sadd.s32 1, %s4880_s18   ;;  %s28_s20 = sadd.s32 1, %s4876_s17 }
  0x2c   : > { %s25_s14 = ssub.s32 %s4880_s18, %s4987_s13  ;;  %p35_p2 = scmp.ne.s32.totalorder %s4876_s17, %s4872_s16 }
  0x2d   : > { %p26_p1 = scmp.eq.s32.totalorder %s25_s14, 0  ;;  %p36_p6 = scmp.eq.s32.totalorder %s4880_s18, 0 }
  0x2e   : > { %p5190_p5 = scmp.eq.s32.totalorder %s4937_s19, 3  ;;  %p4095_p9 = scmp.lt.s32.totalorder %s4880_s18, 4 }
  0x2f   : > { %s4996_s24 = scalar_select %p26_p1, %s4876_s17, %s28_s20  }
  0x30   : > { %p37_p11 = por %p36_p6, %p35_p2  ;;  %p5000_p7 = por %p5190_p5, %p35_p2 }
  0x31   : > { %s185_s26 = sand.u32 1, %s4876_s17   ;;  %s4056_s28 = sshll.u32 %s4880_s18, 9 }
  0x32   : > { %s5191_s25 = scalar_select %p5000_p7, 1, 0 }
  0x33   : > { %s3648_s27 = sshll.u32 %s185_s26, 5  ;;  %s5010_s5 = scalar_lea.hbm %s5177_s0, %s4056_s28 }
  0x34   : > { %s189_s6 = scalar_lea.vmem [#allocation2], %s3648_s27  ;;  %p5012_p10 = pnand %p4095_p9, %p37_p11 }
  0x35   : > { %s197_s7 = sshll.u32 %s189_s6, 4  ;;  %s186_s9 = scalar_lea.sflag [#allocation3], %s185_s26  ;;  %s198_s7 = int_to_ptr.vmem [resolvable:$true] %s197_s7 }
  0x36   : > { %s4784_s10 = scalar_lea.hbm %s5010_s5, 512  ;;  %p4786_p13 = pneg %p5012_p10 }
  0x37   : > { %p4785_p12 = scmp.ne.s32.totalorder %s5010_s5, %s4784_s10  ;;  %s4789_s14 = scalar_lea.hbm %s5177_s0, 2048 }
  0x38   : > { %p4790_p1 = scmp.lt.s32.totalorder %s5010_s5, %s5177_s0  ;;  %p4791_p2 = scmp.lt.s32.totalorder %s4789_s14, %s4784_s10 }
  0x39   : > { %p4787_p3 = pnand %p4786_p13, %p4785_p12 }
  0x3a   : > { %p4792_p6 = por %p4791_p2, %p4790_p1 }
  0x3b   : > { %p4788_p0 = pneg %p4787_p3 }
  0x3d   : > { %p4793_p11 = pnand %p4792_p6, %p4788_p0 }
  0x3f   : > { %4796 = shalt.err (!%p4793_p11)
}
  0x40   : > { %s4797_s28 = scalar_lea.vmem %s198_s7, 512  ;;  %s4888_s26 = smov [#allocation2]  }
  0x41   : > { %p4798_p5 = scmp.ne.s32.totalorder %s198_s7, %s4797_s28  ;;  %s4802_s29 = sshll.u32 %s4888_s26, 4  ;;  %s4803_s29 = int_to_ptr.vmem [resolvable:$false] %s4802_s29 }
  0x42   : > { %s4804_s30 = scalar_lea.vmem %s4803_s29, 1024  ;;  %p4805_p12 = scmp.lt.s32.totalorder %s198_s7, %s4803_s29 }
  0x43   : > { %p4800_p9 = pnand %p4798_p5, %p4786_p13  ;;  %p4806_p3 = scmp.lt.s32.totalorder %s4804_s30, %s4797_s28 }
  0x45   : > { %p4801_p7 = pneg %p4800_p9  ;;  %p4807_p4 = por %p4806_p3, %p4805_p12 }
  0x47   : > { %p4808_p8 = pnand %p4807_p4, %p4801_p7 }
  0x49   : > { %4811 = shalt.err (!%p4808_p8)
}
  0x4a   : > { %4088 = dma.hbm_to_vmem [thread:$0]  (!%p5012_p10), %s5010_s5, 512, %s198_s7, %s186_s9  }
  0x4b   : > { %p5193_p0 = scmp.ne.s32.totalorder %s5188_s23, 0 }
  0x4c   : > { %s5033_s6 = sand.u32 (!%p5193_p0), 1, %s4872_s16   ;;  %p5194_p4 = scmp.ne.s32.totalorder (!%p5193_p0), %s5186_s21, 0 }
  0x4d   : > { %213 = sbr.rel (%p5193_p0) target bundleno = 1759 (0x6df), region = 36  ;;  %s3652_s10 = sshll.u32 (!%p5193_p0), %s5033_s6, 5 }
  0x4e   : > { %s216_s11 = scalar_lea.sflag (!%p5193_p0), [#allocation3], %s5033_s6  ;;  %s5039_s12 = scalar_lea.vmem (!%p5193_p0), [#allocation2], %s3652_s10 }
  0x52   : > { %4855 = dma.done.wait (%p5194_p4), %s216_s11, 512  }
  0x53   : > { %4857 = vsyncadd (%p5194_p4), %s216_s11, 4294966784  ;;  %p5195_p8 = scmp.eq.s32.totalorder %s4937_s19, 0 }
  0x55   : > { %4859 = dma.done.wait (%p5195_p8), [#allocation6], 49664   ;;  %p5196_p7 = pmov %p5195_p8 }
  0x56   : > { %v4138_v0 = vld [vmem:[#allocation5 + $0x2a4] ss:$48 sps:$4 sm:$0xff]   ;;  %v4142_v2 = vld [vmem:[#allocation5 + $0x2a0] ss:$48 sps:$4 sm:$0xff]   ;;  %v262_v46 = vld [vmem:[%s5039_s12 + $0x8] sm:$0xff]  ;;  %p256_p10 = scmp.lt.s32.totalorder %s4937_s19, 3 }
  0x57   : > { %4861 = vsyncadd (%p5196_p7), [#allocation6], 4294917632  ;;  %v4140_v1 = vld [vmem:[#allocation5 + $0x8a4] ss:$48 sps:$4 sm:$0xff]   ;;  %2575 = vmatprep.subr.bf16.mxu0 %v4138_v0  ;;  %v4143_v3 = vld [vmem:[#allocation5 + $0x8a0] ss:$48 sps:$4 sm:$0xff]   ;;  %v5050_v49 = vpack.c.bf16 %v262_v46, %v262_v46 }
  0x58   : > { %2616 = vmatprep.subr.bf16.mxu1 %v4140_v1  ;;  %v4144_v4 = vld [vmem:[#allocation5 + $0x244] ss:$48 sps:$4 sm:$0xff]   ;;  %2576 = vmatpush1.bf16.msra.mxu0 %v4142_v2  ;;  %v4148_v6 = vld [vmem:[#allocation5 + $0x240] ss:$48 sps:$4 sm:$0xff]   ;;  %v264_v50 = vld [vmem:[%s5039_s12 + $0x18] sm:$0xff]  ;;  %s257_s21 = scalar_select %p256_p10, %s4937_s19, 3 }
  0x59   : > { %2617 = vmatpush1.bf16.msra.mxu1 %v4143_v3  ;;  %v4146_v5 = vld [vmem:[#allocation5 + $0x844] ss:$48 sps:$4 sm:$0xff]   ;;  %2577 = vmatprep.subr.bf16.mxu0 %v4144_v4  ;;  %v4149_v7 = vld [vmem:[#allocation5 + $0x840] ss:$48 sps:$4 sm:$0xff]   ;;  %v5053_v52 = vpack.c.bf16 %v264_v50, %v264_v50  ;;  %v4288_v46 = vld [vmem:[#allocation5 + $0x548] ss:$48 sps:$4 sm:$0xff]  }
  0x5a   : > { %2618 = vmatprep.subr.bf16.mxu1 %v4146_v5  ;;  %v4150_v8 = vld [vmem:[#allocation5 + $0x1e4] ss:$48 sps:$4 sm:$0xff]   ;;  %v4154_v10 = vld [vmem:[#allocation5 + $0x1e0] ss:$48 sps:$4 sm:$0xff]   ;;  %2607 = vmatprep.mubr.bf16.mxu0 %v5050_v49  ;;  %v4299_v50 = vld [vmem:[#allocation5 + $0xaec] ss:$48 sps:$4 sm:$0xff]  }
  0x5b   : > { %v4152_v9 = vld [vmem:[#allocation5 + $0x7e4] ss:$48 sps:$4 sm:$0xff]   ;;  %v4155_v11 = vld [vmem:[#allocation5 + $0x7e0] ss:$48 sps:$4 sm:$0xff]   ;;  %2648 = vmatprep.mubr.bf16.mxu1 %v5053_v52  ;;  %s3656_s23 = sshll.u32 %s257_s21, 3  ;;  %vm3091_vm0 = vcmask 130048  }
  0x5c   : > { %2578 = vmatpush1.bf16.msra.mxu0 %v4148_v6  ;;  %v4156_v12 = vld [vmem:[#allocation5 + $0x184] ss:$48 sps:$4 sm:$0xff]   ;;  %v4160_v14 = vld [vmem:[#allocation5 + $0x180] ss:$48 sps:$4 sm:$0xff]   ;;  %v4236_v6 = vld [vmem:[#allocation5 + $0x2ac] ss:$48 sps:$4 sm:$0xff]   ;;  %s259_s8 = scalar_lea.vmem %s5178_s1, %s3656_s23 }
  0x5d   : > { %2619 = vmatpush1.bf16.msra.mxu1 %v4149_v7  ;;  %2579 = vmatprep.subr.bf16.mxu0 %v4150_v8  ;;  %v4158_v13 = vld [vmem:[#allocation5 + $0x784] ss:$48 sps:$4 sm:$0xff]   ;;  %v4161_v15 = vld [vmem:[#allocation5 + $0x780] ss:$48 sps:$4 sm:$0xff]   ;;  %v4239_v7 = vld [vmem:[#allocation5 + $0x8ac] ss:$48 sps:$4 sm:$0xff]  }
  0x5e   : > { %2620 = vmatprep.subr.bf16.mxu1 %v4152_v9  ;;  %v4162_v16 = vld [vmem:[#allocation5 + $0x124] ss:$48 sps:$4 sm:$0xff]   ;;  %v4166_v18 = vld [vmem:[#allocation5 + $0x120] ss:$48 sps:$4 sm:$0xff]   ;;  %vm3299_vm1 = vcmask 1043456   ;;  %vm3266_vm2 = vcmask 64512  }
  0x5f   : > { %v4164_v17 = vld [vmem:[#allocation5 + $0x724] ss:$48 sps:$4 sm:$0xff]   ;;  %v4167_v19 = vld [vmem:[#allocation5 + $0x720] ss:$48 sps:$4 sm:$0xff]   ;;  %s5125_s27 = scalar_lea.vmem [#allocation8], %s3652_s10  ;;  %s4057_s26 = sshll.u32 %s4937_s19, 9 }
  0x60   : > { %2580 = vmatpush1.bf16.msra.mxu0 %v4154_v10  ;;  %v4168_v20 = vld [vmem:[#allocation5 + $0xc4] ss:$48 sps:$4 sm:$0xff]   ;;  %v4172_v22 = vld [vmem:[#allocation5 + $0xc0] ss:$48 sps:$4 sm:$0xff]   ;;  %v4234_v10 = vld [vmem:[#allocation5 + $0x2a8] ss:$48 sps:$4 sm:$0xff]   ;;  %s5140_s11 = scalar_lea.hbm %s5181_s4, %s4057_s26 }
  0x61   : > { %2621 = vmatpush1.bf16.msra.mxu1 %v4155_v11  ;;  %2581 = vmatprep.subr.bf16.mxu0 %v4156_v12  ;;  %v4170_v21 = vld [vmem:[#allocation5 + $0x6c4] ss:$48 sps:$4 sm:$0xff]   ;;  %v4173_v23 = vld [vmem:[#allocation5 + $0x6c0] ss:$48 sps:$4 sm:$0xff]   ;;  %v4237_v11 = vld [vmem:[#allocation5 + $0x8a8] ss:$48 sps:$4 sm:$0xff]  }
  0x62   : > { %2622 = vmatprep.subr.bf16.mxu1 %v4158_v13  ;;  %v4174_v24 = vld [vmem:[#allocation5 + $0x64] ss:$48 sps:$4 sm:$0xff]   ;;  %v4178_v26 = vld [vmem:[#allocation5 + $0x60] ss:$48 sps:$4 sm:$0xff]   ;;  %v4242_v12 = vld [vmem:[#allocation5 + $0x24c] ss:$48 sps:$4 sm:$0xff]  }
  0x63   : > { %v4176_v25 = vld [vmem:[#allocation5 + $0x664] ss:$48 sps:$4 sm:$0xff]   ;;  %v4179_v27 = vld [vmem:[#allocation5 + $0x660] ss:$48 sps:$4 sm:$0xff]   ;;  %v4245_v13 = vld [vmem:[#allocation5 + $0x84c] ss:$48 sps:$4 sm:$0xff]  }
  0x64   : > { %2582 = vmatpush1.bf16.msra.mxu0 %v4160_v14  ;;  %v4180_v28 = vld [vmem:[#allocation5 + $0x4] ss:$48 sps:$4 sm:$0xff]   ;;  %v4184_v30 = vld [vmem:[#allocation5] ss:$48 sps:$4 sm:$0xff]   ;;  %v4240_v14 = vld [vmem:[#allocation5 + $0x248] ss:$48 sps:$4 sm:$0xff]  }
  0x65   : > { %2623 = vmatpush1.bf16.msra.mxu1 %v4161_v15  ;;  %2583 = vmatprep.subr.bf16.mxu0 %v4162_v16  ;;  %v4182_v29 = vld [vmem:[#allocation5 + $0x604] ss:$48 sps:$4 sm:$0xff]   ;;  %v4185_v31 = vld [vmem:[#allocation5 + $0x600] ss:$48 sps:$4 sm:$0xff]   ;;  %v4243_v15 = vld [vmem:[#allocation5 + $0x848] ss:$48 sps:$4 sm:$0xff]  }
  0x66   : > { %2624 = vmatprep.subr.bf16.mxu1 %v4164_v17  ;;  %v4186_v32 = vld [vmem:[#allocation5 + $0x5a4] ss:$48 sps:$4 sm:$0xff]   ;;  %v4190_v34 = vld [vmem:[#allocation5 + $0x5a0] ss:$48 sps:$4 sm:$0xff]   ;;  %v4248_v16 = vld [vmem:[#allocation5 + $0x1ec] ss:$48 sps:$4 sm:$0xff]  }
  0x67   : > { %v4188_v33 = vld [vmem:[#allocation5 + $0xba4] ss:$48 sps:$4 sm:$0xff]   ;;  %v4191_v35 = vld [vmem:[#allocation5 + $0xba0] ss:$48 sps:$4 sm:$0xff]   ;;  %v4251_v17 = vld [vmem:[#allocation5 + $0x7ec] ss:$48 sps:$4 sm:$0xff]  }
  0x68   : > { %2584 = vmatpush1.bf16.msra.mxu0 %v4166_v18  ;;  %v4192_v36 = vld [vmem:[#allocation5 + $0x544] ss:$48 sps:$4 sm:$0xff]   ;;  %v4196_v38 = vld [vmem:[#allocation5 + $0x540] ss:$48 sps:$4 sm:$0xff]   ;;  %v4246_v18 = vld [vmem:[#allocation5 + $0x1e8] ss:$48 sps:$4 sm:$0xff]  }
  0x69   : > { %2625 = vmatpush1.bf16.msra.mxu1 %v4167_v19  ;;  %2585 = vmatprep.subr.bf16.mxu0 %v4168_v20  ;;  %v4194_v37 = vld [vmem:[#allocation5 + $0xb44] ss:$48 sps:$4 sm:$0xff]   ;;  %v4197_v39 = vld [vmem:[#allocation5 + $0xb40] ss:$48 sps:$4 sm:$0xff]   ;;  %v4249_v19 = vld [vmem:[#allocation5 + $0x7e8] ss:$48 sps:$4 sm:$0xff]  }
  0x6a   : > { %2626 = vmatprep.subr.bf16.mxu1 %v4170_v21  ;;  %v4198_v40 = vld [vmem:[#allocation5 + $0x4e4] ss:$48 sps:$4 sm:$0xff]   ;;  %v4202_v42 = vld [vmem:[#allocation5 + $0x4e0] ss:$48 sps:$4 sm:$0xff]   ;;  %v4254_v20 = vld [vmem:[#allocation5 + $0x18c] ss:$48 sps:$4 sm:$0xff]  }
  0x6b   : > { %v4200_v41 = vld [vmem:[#allocation5 + $0xae4] ss:$48 sps:$4 sm:$0xff]   ;;  %v4203_v43 = vld [vmem:[#allocation5 + $0xae0] ss:$48 sps:$4 sm:$0xff]   ;;  %v4257_v21 = vld [vmem:[#allocation5 + $0x78c] ss:$48 sps:$4 sm:$0xff]  }
  0x6c   : > { %2586 = vmatpush1.bf16.msra.mxu0 %v4172_v22  ;;  %v4204_v44 = vld [vmem:[#allocation5 + $0x484] ss:$48 sps:$4 sm:$0xff]   ;;  %v4208_v47 = vld [vmem:[#allocation5 + $0x480] ss:$48 sps:$4 sm:$0xff]   ;;  %v4252_v22 = vld [vmem:[#allocation5 + $0x188] ss:$48 sps:$4 sm:$0xff]  }
  0x6d   : > { %2627 = vmatpush1.bf16.msra.mxu1 %v4173_v23  ;;  %2587 = vmatprep.subr.bf16.mxu0 %v4174_v24  ;;  %v4206_v45 = vld [vmem:[#allocation5 + $0xa84] ss:$48 sps:$4 sm:$0xff]   ;;  %v4209_v48 = vld [vmem:[#allocation5 + $0xa80] ss:$48 sps:$4 sm:$0xff]   ;;  %v4255_v23 = vld [vmem:[#allocation5 + $0x788] ss:$48 sps:$4 sm:$0xff]  }
  0x6e   : > { %2628 = vmatprep.subr.bf16.mxu1 %v4176_v25  ;;  %v4210_v51 = vld [vmem:[#allocation5 + $0x424] ss:$48 sps:$4 sm:$0xff]   ;;  %v4214_v54 = vld [vmem:[#allocation5 + $0x420] ss:$48 sps:$4 sm:$0xff]   ;;  %v4260_v24 = vld [vmem:[#allocation5 + $0x12c] ss:$48 sps:$4 sm:$0xff]  }
  0x6f   : > { %v4212_v53 = vld [vmem:[#allocation5 + $0xa24] ss:$48 sps:$4 sm:$0xff]   ;;  %v4215_v55 = vld [vmem:[#allocation5 + $0xa20] ss:$48 sps:$4 sm:$0xff]   ;;  %v4263_v25 = vld [vmem:[#allocation5 + $0x72c] ss:$48 sps:$4 sm:$0xff]  }
  0x70   : > { %2588 = vmatpush1.bf16.msra.mxu0 %v4178_v26  ;;  %v4216_v56 = vld [vmem:[#allocation5 + $0x3c4] ss:$48 sps:$4 sm:$0xff]   ;;  %v4220_v58 = vld [vmem:[#allocation5 + $0x3c0] ss:$48 sps:$4 sm:$0xff]   ;;  %v4258_v26 = vld [vmem:[#allocation5 + $0x128] ss:$48 sps:$4 sm:$0xff]  }
  0x71   : > { %2629 = vmatpush1.bf16.msra.mxu1 %v4179_v27  ;;  %2589 = vmatprep.subr.bf16.mxu0 %v4180_v28  ;;  %v4218_v57 = vld [vmem:[#allocation5 + $0x9c4] ss:$48 sps:$4 sm:$0xff]   ;;  %v4221_v59 = vld [vmem:[#allocation5 + $0x9c0] ss:$48 sps:$4 sm:$0xff]   ;;  %v4261_v27 = vld [vmem:[#allocation5 + $0x728] ss:$48 sps:$4 sm:$0xff]  }
  0x72   : > { %2630 = vmatprep.subr.bf16.mxu1 %v4182_v29  ;;  %v4222_v60 = vld [vmem:[#allocation5 + $0x364] ss:$48 sps:$4 sm:$0xff]   ;;  %v4226_v62 = vld [vmem:[#allocation5 + $0x360] ss:$48 sps:$4 sm:$0xff]   ;;  %v4266_v28 = vld [vmem:[#allocation5 + $0xcc] ss:$48 sps:$4 sm:$0xff]  }
  0x73   : > { %v4224_v61 = vld [vmem:[#allocation5 + $0x964] ss:$48 sps:$4 sm:$0xff]   ;;  %v4227_v63 = vld [vmem:[#allocation5 + $0x960] ss:$48 sps:$4 sm:$0xff]   ;;  %v4269_v29 = vld [vmem:[#allocation5 + $0x6cc] ss:$48 sps:$4 sm:$0xff]  }
  0x74   : > { %2590 = vmatpush1.bf16.msra.mxu0 %v4184_v30  ;;  %v4228_v0 = vld [vmem:[#allocation5 + $0x304] ss:$48 sps:$4 sm:$0xff]   ;;  %v4232_v2 = vld [vmem:[#allocation5 + $0x300] ss:$48 sps:$4 sm:$0xff]   ;;  %v4264_v30 = vld [vmem:[#allocation5 + $0xc8] ss:$48 sps:$4 sm:$0xff]  }
  0x75   : > { %2631 = vmatpush1.bf16.msra.mxu1 %v4185_v31  ;;  %2591 = vmatprep.subr.bf16.mxu0 %v4186_v32  ;;  %v4230_v1 = vld [vmem:[#allocation5 + $0x904] ss:$48 sps:$4 sm:$0xff]   ;;  %v4233_v3 = vld [vmem:[#allocation5 + $0x900] ss:$48 sps:$4 sm:$0xff]   ;;  %v4267_v31 = vld [vmem:[#allocation5 + $0x6c8] ss:$48 sps:$4 sm:$0xff]  }
  0x76   : > { %2632 = vmatprep.subr.bf16.mxu1 %v4188_v33  ;;  %v261_v4 = vld [vmem:[%s5039_s12] sm:$0xff]  ;;  %v263_v5 = vld [vmem:[%s5039_s12 + $0x10] sm:$0xff]  ;;  %v4272_v32 = vld [vmem:[#allocation5 + $0x6c] ss:$48 sps:$4 sm:$0xff]   ;;  %s3542_s29 = sshll.u32 %s5125_s27, 4  ;;  %s3528_s21 = scalar_lea.sflag [#allocation4], %s5033_s6  ;;  %s3543_s29 = int_to_ptr.vmem [resolvable:$true] %s3542_s29 }
  0x77   : > { %v5059_v8 = vpack.c.bf16 %v261_v4, %v261_v4  ;;  %v5061_v9 = vpack.c.bf16 %v263_v5, %v263_v5  ;;  %v4275_v33 = vld [vmem:[#allocation5 + $0x66c] ss:$48 sps:$4 sm:$0xff]   ;;  %v4318_v4 = vld [vmem:[#allocation5 + $0x368] ss:$48 sps:$4 sm:$0xff]   ;;  %s4812_s23 = scalar_lea.vmem %s3543_s29, 512  ;;  %p5197_p1 = scmp.ne.s32.totalorder %s5191_s25, 0 }
  0x78   : > { %2592 = vmatpush2.bf16.msra.mxu0 %v4190_v34  ;;  %v4270_v34 = vld [vmem:[#allocation5 + $0x68] ss:$48 sps:$4 sm:$0xff]   ;;  %p4813_p13 = scmp.ne.s32.totalorder %s3543_s29, %s4812_s23  ;;  %s4890_s19 = smov [#allocation8]  }
  0x79   : > { %2633 = vmatpush2.bf16.msra.mxu1 %v4191_v35  ;;  %2593 = vmatprep.subr.bf16.mxu0 %v4192_v36  ;;  %v4273_v35 = vld [vmem:[#allocation5 + $0x668] ss:$48 sps:$4 sm:$0xff]   ;;  %v4278_v36 = vld [vmem:[#allocation5 + $0xc] ss:$48 sps:$4 sm:$0xff]   ;;  %s4816_s5 = sshll.u32 %s4890_s19, 4  ;;  %s4817_s5 = int_to_ptr.vmem [resolvable:$false] %s4816_s5 }
  0x7a   : > { %2634 = vmatprep.subr.bf16.mxu1 %v4194_v37  ;;  %v4281_v37 = vld [vmem:[#allocation5 + $0x60c] ss:$48 sps:$4 sm:$0xff]   ;;  %v4321_v5 = vld [vmem:[#allocation5 + $0x968] ss:$48 sps:$4 sm:$0xff]   ;;  %p4814_p2 = pnand %p4813_p13, %p5197_p1  ;;  %s4818_s7 = scalar_lea.vmem %s4817_s5, 1024 }
  0x7b   : > { %p4819_p11 = scmp.lt.s32.totalorder %s3543_s29, %s4817_s5  ;;  %p4820_p5 = scmp.lt.s32.totalorder %s4818_s7, %s4812_s23 }
  0x7c   : > { %2594 = vmatpush2.bf16.msra.mxu0 %v4196_v38  ;;  %v4276_v38 = vld [vmem:[#allocation5 + $0x8] ss:$48 sps:$4 sm:$0xff]   ;;  %p4815_p6 = pneg %p4814_p2 }
  0x7d   : > { %2635 = vmatpush2.bf16.msra.mxu1 %v4197_v39  ;;  %2595 = vmatprep.subr.bf16.mxu0 %v4198_v40  ;;  %v4279_v39 = vld [vmem:[#allocation5 + $0x608] ss:$48 sps:$4 sm:$0xff]   ;;  %v4284_v40 = vld [vmem:[#allocation5 + $0x5ac] ss:$48 sps:$4 sm:$0xff]   ;;  %p4821_p9 = por %p4820_p5, %p4819_p11 }
  0x7e   : > { %2636 = vmatprep.subr.bf16.mxu1 %v4200_v41  ;;  %v4287_v41 = vld [vmem:[#allocation5 + $0xbac] ss:$48 sps:$4 sm:$0xff]  }
  0x7f   : > { %p4822_p12 = pnand %p4821_p9, %p4815_p6 }
  0x80   : > { %2596 = vmatpush2.bf16.msra.mxu0 %v4202_v42  ;;  %v4282_v42 = vld [vmem:[#allocation5 + $0x5a8] ss:$48 sps:$4 sm:$0xff]  }
  0x81   : > { %2637 = vmatpush2.bf16.msra.mxu1 %v4203_v43  ;;  %2597 = vmatprep.subr.bf16.mxu0 %v4204_v44  ;;  %v4285_v43 = vld [vmem:[#allocation5 + $0xba8] ss:$48 sps:$4 sm:$0xff]   ;;  %v4290_v44 = vld [vmem:[#allocation5 + $0x54c] ss:$48 sps:$4 sm:$0xff]  }
  0x82   : > { %2638 = vmatprep.subr.bf16.mxu1 %v4206_v45  ;;  %v4293_v45 = vld [vmem:[#allocation5 + $0xb4c] ss:$48 sps:$4 sm:$0xff]  }
  0x84   : > { %2598 = vmatpush2.bf16.msra.mxu0 %v4208_v47  ;;  %v4291_v47 = vld [vmem:[#allocation5 + $0xb48] ss:$48 sps:$4 sm:$0xff]  }
  0x85   : > { %2639 = vmatpush2.bf16.msra.mxu1 %v4209_v48  ;;  %2599 = vmatprep.subr.bf16.mxu0 %v4210_v51  ;;  %v4296_v48 = vld [vmem:[#allocation5 + $0x4ec] ss:$48 sps:$4 sm:$0xff]   ;;  %v4294_v51 = vld [vmem:[#allocation5 + $0x4e8] ss:$48 sps:$4 sm:$0xff]  }
  0x86   : > { %2640 = vmatprep.subr.bf16.mxu1 %v4212_v53  ;;  %v4297_v53 = vld [vmem:[#allocation5 + $0xae8] ss:$48 sps:$4 sm:$0xff]  }
  0x88   : > { %2600 = vmatpush2.bf16.msra.mxu0 %v4214_v54  ;;  %v4302_v54 = vld [vmem:[#allocation5 + $0x48c] ss:$48 sps:$4 sm:$0xff]  }
  0x89   : > { %2641 = vmatpush2.bf16.msra.mxu1 %v4215_v55  ;;  %2601 = vmatprep.subr.bf16.mxu0 %v4216_v56  ;;  %v4305_v55 = vld [vmem:[#allocation5 + $0xa8c] ss:$48 sps:$4 sm:$0xff]   ;;  %v4300_v56 = vld [vmem:[#allocation5 + $0x488] ss:$48 sps:$4 sm:$0xff]  }
  0x8a   : > { %2642 = vmatprep.subr.bf16.mxu1 %v4218_v57  ;;  %v4303_v57 = vld [vmem:[#allocation5 + $0xa88] ss:$48 sps:$4 sm:$0xff]  }
  0x8c   : > { %2602 = vmatpush2.bf16.msra.mxu0 %v4220_v58  ;;  %v4308_v58 = vld [vmem:[#allocation5 + $0x42c] ss:$48 sps:$4 sm:$0xff]  }
  0x8d   : > { %2643 = vmatpush2.bf16.msra.mxu1 %v4221_v59  ;;  %2603 = vmatprep.subr.bf16.mxu0 %v4222_v60  ;;  %v4311_v59 = vld [vmem:[#allocation5 + $0xa2c] ss:$48 sps:$4 sm:$0xff]   ;;  %v4306_v60 = vld [vmem:[#allocation5 + $0x428] ss:$48 sps:$4 sm:$0xff]  }
  0x8e   : > { %2644 = vmatprep.subr.bf16.mxu1 %v4224_v61  ;;  %v4309_v61 = vld [vmem:[#allocation5 + $0xa28] ss:$48 sps:$4 sm:$0xff]  }
  0x90   : > { %2604 = vmatpush2.bf16.msra.mxu0 %v4226_v62  ;;  %v4314_v62 = vld [vmem:[#allocation5 + $0x3cc] ss:$48 sps:$4 sm:$0xff]  }
  0x91   : > { %2645 = vmatpush2.bf16.msra.mxu1 %v4227_v63  ;;  %2605 = vmatprep.subr.bf16.mxu0 %v4228_v0  ;;  %v4317_v63 = vld [vmem:[#allocation5 + $0x9cc] ss:$48 sps:$4 sm:$0xff]   ;;  %v4312_v0 = vld [vmem:[#allocation5 + $0x3c8] ss:$48 sps:$4 sm:$0xff]  }
  0x92   : > { %2646 = vmatprep.subr.bf16.mxu1 %v4230_v1  ;;  %v4315_v1 = vld [vmem:[#allocation5 + $0x9c8] ss:$48 sps:$4 sm:$0xff]  }
  0x94   : > { %2606 = vmatpush2.bf16.msra.mxu0 %v4232_v2  ;;  %v4320_v2 = vld [vmem:[#allocation5 + $0x36c] ss:$48 sps:$4 sm:$0xff]  }
  0x95   : > { %2647 = vmatpush2.bf16.msra.mxu1 %v4233_v3  ;;  %2657 = vmatprep.subr.bf16.mxu0 %v4236_v6  ;;  %v4323_v3 = vld [vmem:[#allocation5 + $0x96c] ss:$48 sps:$4 sm:$0xff]  }
  0x96   : > { %2698 = vmatprep.subr.bf16.mxu1 %v4239_v7  ;;  %v4326_v6 = vld [vmem:[#allocation5 + $0x30c] ss:$48 sps:$4 sm:$0xff]  }
  0x97   : > { %2608 = vmatmul.mubr.bf16.vlgmr.msra.gmra.mxu0 %v5059_v8  ;;  %v4329_v7 = vld [vmem:[#allocation5 + $0x90c] ss:$48 sps:$4 sm:$0xff]  }
  0x98   : > { %2649 = vmatmul.mubr.bf16.vlgmr.msra.gmra.mxu1 %v5061_v9  ;;  %2658 = vmatpush1.bf16.msra.mxu0 %v4234_v10  ;;  %v4324_v10 = vld [vmem:[#allocation5 + $0x308] ss:$48 sps:$4 sm:$0xff]  }
  0x99   : > { %2699 = vmatpush1.bf16.msra.mxu1 %v4237_v11  ;;  %2659 = vmatprep.subr.bf16.mxu0 %v4242_v12  ;;  %v4327_v11 = vld [vmem:[#allocation5 + $0x908] ss:$48 sps:$4 sm:$0xff]   ;;  %v4332_v12 = vld [vmem:[#allocation5 + $0x2b4] ss:$48 sps:$4 sm:$0xff]  }
  0x9a   : > { %2700 = vmatprep.subr.bf16.mxu1 %v4245_v13  ;;  %2689 = vmatprep.mubr.bf16.mxu0 %v5050_v49  ;;  %v4335_v13 = vld [vmem:[#allocation5 + $0x8b4] ss:$48 sps:$4 sm:$0xff]  }
  0x9b   : > { %2730 = vmatprep.mubr.bf16.mxu1 %v5053_v52 }
  0x9c   : > { %2660 = vmatpush1.bf16.msra.mxu0 %v4240_v14  ;;  %v4330_v14 = vld [vmem:[#allocation5 + $0x2b0] ss:$48 sps:$4 sm:$0xff]  }
  0x9d   : > { %2701 = vmatpush1.bf16.msra.mxu1 %v4243_v15  ;;  %2661 = vmatprep.subr.bf16.mxu0 %v4248_v16  ;;  %v4333_v15 = vld [vmem:[#allocation5 + $0x8b0] ss:$48 sps:$4 sm:$0xff]   ;;  %v4338_v16 = vld [vmem:[#allocation5 + $0x254] ss:$48 sps:$4 sm:$0xff]  }
  0x9e   : > { %2702 = vmatprep.subr.bf16.mxu1 %v4251_v17  ;;  %v4341_v17 = vld [vmem:[#allocation5 + $0x854] ss:$48 sps:$4 sm:$0xff]  }
  0xa0   : > { %2662 = vmatpush1.bf16.msra.mxu0 %v4246_v18  ;;  %v4336_v18 = vld [vmem:[#allocation5 + $0x250] ss:$48 sps:$4 sm:$0xff]  }
  0xa1   : > { %2703 = vmatpush1.bf16.msra.mxu1 %v4249_v19  ;;  %2663 = vmatprep.subr.bf16.mxu0 %v4254_v20  ;;  %v4339_v19 = vld [vmem:[#allocation5 + $0x850] ss:$48 sps:$4 sm:$0xff]   ;;  %v4344_v20 = vld [vmem:[#allocation5 + $0x1f4] ss:$48 sps:$4 sm:$0xff]  }
  0xa2   : > { %2704 = vmatprep.subr.bf16.mxu1 %v4257_v21  ;;  %v4347_v21 = vld [vmem:[#allocation5 + $0x7f4] ss:$48 sps:$4 sm:$0xff]  }
  0xa4   : > { %2664 = vmatpush1.bf16.msra.mxu0 %v4252_v22  ;;  %v4342_v22 = vld [vmem:[#allocation5 + $0x1f0] ss:$48 sps:$4 sm:$0xff]  }
  0xa5   : > { %2705 = vmatpush1.bf16.msra.mxu1 %v4255_v23  ;;  %2665 = vmatprep.subr.bf16.mxu0 %v4260_v24  ;;  %v4345_v23 = vld [vmem:[#allocation5 + $0x7f0] ss:$48 sps:$4 sm:$0xff]   ;;  %v4350_v24 = vld [vmem:[#allocation5 + $0x194] ss:$48 sps:$4 sm:$0xff]  }
  0xa6   : > { %2706 = vmatprep.subr.bf16.mxu1 %v4263_v25  ;;  %v4353_v25 = vld [vmem:[#allocation5 + $0x794] ss:$48 sps:$4 sm:$0xff]  }
  0xa8   : > { %2666 = vmatpush1.bf16.msra.mxu0 %v4258_v26  ;;  %v4348_v26 = vld [vmem:[#allocation5 + $0x190] ss:$48 sps:$4 sm:$0xff]  }
  0xa9   : > { %2707 = vmatpush1.bf16.msra.mxu1 %v4261_v27  ;;  %2667 = vmatprep.subr.bf16.mxu0 %v4266_v28  ;;  %v4351_v27 = vld [vmem:[#allocation5 + $0x790] ss:$48 sps:$4 sm:$0xff]   ;;  %v4356_v28 = vld [vmem:[#allocation5 + $0x134] ss:$48 sps:$4 sm:$0xff]  }
  0xaa   : > { %2708 = vmatprep.subr.bf16.mxu1 %v4269_v29  ;;  %v4359_v29 = vld [vmem:[#allocation5 + $0x734] ss:$48 sps:$4 sm:$0xff]  }
  0xac   : > { %2668 = vmatpush1.bf16.msra.mxu0 %v4264_v30  ;;  %v4354_v30 = vld [vmem:[#allocation5 + $0x130] ss:$48 sps:$4 sm:$0xff]  }
  0xad   : > { %2709 = vmatpush1.bf16.msra.mxu1 %v4267_v31  ;;  %2669 = vmatprep.subr.bf16.mxu0 %v4272_v32  ;;  %v4357_v31 = vld [vmem:[#allocation5 + $0x730] ss:$48 sps:$4 sm:$0xff]   ;;  %v4362_v32 = vld [vmem:[#allocation5 + $0xd4] ss:$48 sps:$4 sm:$0xff]  }
  0xae   : > { %2710 = vmatprep.subr.bf16.mxu1 %v4275_v33  ;;  %v4365_v33 = vld [vmem:[#allocation5 + $0x6d4] ss:$48 sps:$4 sm:$0xff]  }
  0xb0   : > { %2670 = vmatpush1.bf16.msra.mxu0 %v4270_v34  ;;  %v4360_v34 = vld [vmem:[#allocation5 + $0xd0] ss:$48 sps:$4 sm:$0xff]  }
  0xb1   : > { %2711 = vmatpush1.bf16.msra.mxu1 %v4273_v35  ;;  %2671 = vmatprep.subr.bf16.mxu0 %v4278_v36  ;;  %v4363_v35 = vld [vmem:[#allocation5 + $0x6d0] ss:$48 sps:$4 sm:$0xff]   ;;  %v4368_v36 = vld [vmem:[#allocation5 + $0x74] ss:$48 sps:$4 sm:$0xff]  }
  0xb2   : > { %2712 = vmatprep.subr.bf16.mxu1 %v4281_v37  ;;  %v4371_v37 = vld [vmem:[#allocation5 + $0x674] ss:$48 sps:$4 sm:$0xff]  }
  0xb4   : > { %2672 = vmatpush1.bf16.msra.mxu0 %v4276_v38  ;;  %v4366_v38 = vld [vmem:[#allocation5 + $0x70] ss:$48 sps:$4 sm:$0xff]  }
  0xb5   : > { %2713 = vmatpush1.bf16.msra.mxu1 %v4279_v39  ;;  %2673 = vmatprep.subr.bf16.mxu0 %v4284_v40  ;;  %v4369_v39 = vld [vmem:[#allocation5 + $0x670] ss:$48 sps:$4 sm:$0xff]   ;;  %v4374_v40 = vld [vmem:[#allocation5 + $0x14] ss:$48 sps:$4 sm:$0xff]  }
  0xb6   : > { %2714 = vmatprep.subr.bf16.mxu1 %v4287_v41  ;;  %v4377_v41 = vld [vmem:[#allocation5 + $0x614] ss:$48 sps:$4 sm:$0xff]  }
  0xb8   : > { %2674 = vmatpush2.bf16.msra.mxu0 %v4282_v42  ;;  %v4372_v42 = vld [vmem:[#allocation5 + $0x10] ss:$48 sps:$4 sm:$0xff]  }
  0xb9   : > { %2715 = vmatpush2.bf16.msra.mxu1 %v4285_v43  ;;  %2675 = vmatprep.subr.bf16.mxu0 %v4290_v44  ;;  %v4375_v43 = vld [vmem:[#allocation5 + $0x610] ss:$48 sps:$4 sm:$0xff]   ;;  %v4380_v44 = vld [vmem:[#allocation5 + $0x5b4] ss:$48 sps:$4 sm:$0xff]  }
  0xba   : > { %2716 = vmatprep.subr.bf16.mxu1 %v4293_v45  ;;  %v4383_v45 = vld [vmem:[#allocation5 + $0xbb4] ss:$48 sps:$4 sm:$0xff]  }
  0xbc   : > { %2676 = vmatpush2.bf16.msra.mxu0 %v4288_v46  ;;  %v4378_v46 = vld [vmem:[#allocation5 + $0x5b0] ss:$48 sps:$4 sm:$0xff]  }
  0xbd   : > { %2717 = vmatpush2.bf16.msra.mxu1 %v4291_v47  ;;  %2677 = vmatprep.subr.bf16.mxu0 %v4296_v48  ;;  %v4381_v47 = vld [vmem:[#allocation5 + $0xbb0] ss:$48 sps:$4 sm:$0xff]   ;;  %v4386_v48 = vld [vmem:[#allocation5 + $0x554] ss:$48 sps:$4 sm:$0xff]  }
  0xbe   : > { %2718 = vmatprep.subr.bf16.mxu1 %v4299_v50  ;;  %v4389_v50 = vld [vmem:[#allocation5 + $0xb54] ss:$48 sps:$4 sm:$0xff]  }
  0xc0   : > { %2678 = vmatpush2.bf16.msra.mxu0 %v4294_v51  ;;  %v4384_v51 = vld [vmem:[#allocation5 + $0x550] ss:$48 sps:$4 sm:$0xff]  }
  0xc1   : > { %2719 = vmatpush2.bf16.msra.mxu1 %v4297_v53  ;;  %2679 = vmatprep.subr.bf16.mxu0 %v4302_v54  ;;  %v4387_v53 = vld [vmem:[#allocation5 + $0xb50] ss:$48 sps:$4 sm:$0xff]   ;;  %v4392_v54 = vld [vmem:[#allocation5 + $0x4f4] ss:$48 sps:$4 sm:$0xff]  }
  0xc2   : > { %2720 = vmatprep.subr.bf16.mxu1 %v4305_v55  ;;  %v4395_v55 = vld [vmem:[#allocation5 + $0xaf4] ss:$48 sps:$4 sm:$0xff]  }
  0xc4   : > { %2680 = vmatpush2.bf16.msra.mxu0 %v4300_v56  ;;  %v4390_v56 = vld [vmem:[#allocation5 + $0x4f0] ss:$48 sps:$4 sm:$0xff]  }
  0xc5   : > { %2721 = vmatpush2.bf16.msra.mxu1 %v4303_v57  ;;  %2681 = vmatprep.subr.bf16.mxu0 %v4308_v58  ;;  %v4393_v57 = vld [vmem:[#allocation5 + $0xaf0] ss:$48 sps:$4 sm:$0xff]   ;;  %v4398_v58 = vld [vmem:[#allocation5 + $0x494] ss:$48 sps:$4 sm:$0xff]  }
  0xc6   : > { %2722 = vmatprep.subr.bf16.mxu1 %v4311_v59  ;;  %v4401_v59 = vld [vmem:[#allocation5 + $0xa94] ss:$48 sps:$4 sm:$0xff]  }
  0xc8   : > { %2682 = vmatpush2.bf16.msra.mxu0 %v4306_v60  ;;  %v4396_v60 = vld [vmem:[#allocation5 + $0x490] ss:$48 sps:$4 sm:$0xff]  }
  0xc9   : > { %2723 = vmatpush2.bf16.msra.mxu1 %v4309_v61  ;;  %2683 = vmatprep.subr.bf16.mxu0 %v4314_v62  ;;  %v4399_v61 = vld [vmem:[#allocation5 + $0xa90] ss:$48 sps:$4 sm:$0xff]   ;;  %v4404_v62 = vld [vmem:[#allocation5 + $0x434] ss:$48 sps:$4 sm:$0xff]  }
  0xca   : > { %2724 = vmatprep.subr.bf16.mxu1 %v4317_v63  ;;  %v4407_v63 = vld [vmem:[#allocation5 + $0xa34] ss:$48 sps:$4 sm:$0xff]  }
  0xcc   : > { %2684 = vmatpush2.bf16.msra.mxu0 %v4312_v0  ;;  %v4402_v0 = vld [vmem:[#allocation5 + $0x430] ss:$48 sps:$4 sm:$0xff]  }
  0xcd   : > { %2725 = vmatpush2.bf16.msra.mxu1 %v4315_v1  ;;  %2685 = vmatprep.subr.bf16.mxu0 %v4320_v2  ;;  %v4405_v1 = vld [vmem:[#allocation5 + $0xa30] ss:$48 sps:$4 sm:$0xff]   ;;  %v4410_v2 = vld [vmem:[#allocation5 + $0x3d4] ss:$48 sps:$4 sm:$0xff]  }
  0xce   : > { %2726 = vmatprep.subr.bf16.mxu1 %v4323_v3  ;;  %v4413_v3 = vld [vmem:[#allocation5 + $0x9d4] ss:$48 sps:$4 sm:$0xff]  }
  0xd0   : > { %2686 = vmatpush2.bf16.msra.mxu0 %v4318_v4  ;;  %v4408_v4 = vld [vmem:[#allocation5 + $0x3d0] ss:$48 sps:$4 sm:$0xff]  }
  0xd1   : > { %2727 = vmatpush2.bf16.msra.mxu1 %v4321_v5  ;;  %2687 = vmatprep.subr.bf16.mxu0 %v4326_v6  ;;  %v4411_v5 = vld [vmem:[#allocation5 + $0x9d0] ss:$48 sps:$4 sm:$0xff]   ;;  %v4416_v6 = vld [vmem:[#allocation5 + $0x374] ss:$48 sps:$4 sm:$0xff]  }
  0xd2   : > { %2728 = vmatprep.subr.bf16.mxu1 %v4329_v7  ;;  %v4419_v7 = vld [vmem:[#allocation5 + $0x974] ss:$48 sps:$4 sm:$0xff]  }
  0xd4   : > { %2688 = vmatpush2.bf16.msra.mxu0 %v4324_v10  ;;  %v4414_v10 = vld [vmem:[#allocation5 + $0x370] ss:$48 sps:$4 sm:$0xff]  }
  0xd5   : > { %2729 = vmatpush2.bf16.msra.mxu1 %v4327_v11  ;;  %2739 = vmatprep.subr.bf16.mxu0 %v4332_v12  ;;  %v4417_v11 = vld [vmem:[#allocation5 + $0x970] ss:$48 sps:$4 sm:$0xff]   ;;  %v4422_v12 = vld [vmem:[#allocation5 + $0x314] ss:$48 sps:$4 sm:$0xff]  }
  0xd6   : > { %2780 = vmatprep.subr.bf16.mxu1 %v4335_v13  ;;  %v4425_v13 = vld [vmem:[#allocation5 + $0x914] ss:$48 sps:$4 sm:$0xff]  }
  0xd7   : > { %2690 = vmatmul.mubr.bf16.vlgmr.msra.gmra.mxu0 %v5059_v8 }
  0xd8   : > { %2731 = vmatmul.mubr.bf16.vlgmr.msra.gmra.mxu1 %v5061_v9  ;;  %2740 = vmatpush1.bf16.msra.mxu0 %v4330_v14  ;;  %v4420_v14 = vld [vmem:[#allocation5 + $0x310] ss:$48 sps:$4 sm:$0xff]  }
  0xd9   : > { %2781 = vmatpush1.bf16.msra.mxu1 %v4333_v15  ;;  %2741 = vmatprep.subr.bf16.mxu0 %v4338_v16  ;;  %v4423_v15 = vld [vmem:[#allocation5 + $0x910] ss:$48 sps:$4 sm:$0xff]   ;;  %v4428_v16 = vld [vmem:[#allocation5 + $0x2bc] ss:$48 sps:$4 sm:$0xff]  }
  0xda   : > { %2782 = vmatprep.subr.bf16.mxu1 %v4341_v17  ;;  %2771 = vmatprep.mubr.bf16.mxu0 %v5050_v49  ;;  %v4431_v17 = vld [vmem:[#allocation5 + $0x8bc] ss:$48 sps:$4 sm:$0xff]  }
  0xdb   : > { %2812 = vmatprep.mubr.bf16.mxu1 %v5053_v52 }
  0xdc   : > { %2742 = vmatpush1.bf16.msra.mxu0 %v4336_v18  ;;  %v4426_v18 = vld [vmem:[#allocation5 + $0x2b8] ss:$48 sps:$4 sm:$0xff]  }
  0xdd   : > { %2783 = vmatpush1.bf16.msra.mxu1 %v4339_v19  ;;  %2743 = vmatprep.subr.bf16.mxu0 %v4344_v20  ;;  %v4429_v19 = vld [vmem:[#allocation5 + $0x8b8] ss:$48 sps:$4 sm:$0xff]   ;;  %v4434_v20 = vld [vmem:[#allocation5 + $0x25c] ss:$48 sps:$4 sm:$0xff]  }
  0xde   : > { %2784 = vmatprep.subr.bf16.mxu1 %v4347_v21  ;;  %v4437_v21 = vld [vmem:[#allocation5 + $0x85c] ss:$48 sps:$4 sm:$0xff]  }
  0xe0   : > { %2744 = vmatpush1.bf16.msra.mxu0 %v4342_v22  ;;  %v4432_v22 = vld [vmem:[#allocation5 + $0x258] ss:$48 sps:$4 sm:$0xff]  }
  0xe1   : > { %2785 = vmatpush1.bf16.msra.mxu1 %v4345_v23  ;;  %2745 = vmatprep.subr.bf16.mxu0 %v4350_v24  ;;  %v4435_v23 = vld [vmem:[#allocation5 + $0x858] ss:$48 sps:$4 sm:$0xff]   ;;  %v4440_v24 = vld [vmem:[#allocation5 + $0x1fc] ss:$48 sps:$4 sm:$0xff]  }
  0xe2   : > { %2786 = vmatprep.subr.bf16.mxu1 %v4353_v25  ;;  %v4443_v25 = vld [vmem:[#allocation5 + $0x7fc] ss:$48 sps:$4 sm:$0xff]  }
  0xe4   : > { %2746 = vmatpush1.bf16.msra.mxu0 %v4348_v26  ;;  %v4438_v26 = vld [vmem:[#allocation5 + $0x1f8] ss:$48 sps:$4 sm:$0xff]  }
  0xe5   : > { %2787 = vmatpush1.bf16.msra.mxu1 %v4351_v27  ;;  %2747 = vmatprep.subr.bf16.mxu0 %v4356_v28  ;;  %v4441_v27 = vld [vmem:[#allocation5 + $0x7f8] ss:$48 sps:$4 sm:$0xff]   ;;  %v4446_v28 = vld [vmem:[#allocation5 + $0x19c] ss:$48 sps:$4 sm:$0xff]  }
  0xe6   : > { %2788 = vmatprep.subr.bf16.mxu1 %v4359_v29  ;;  %v4449_v29 = vld [vmem:[#allocation5 + $0x79c] ss:$48 sps:$4 sm:$0xff]  }
  0xe8   : > { %2748 = vmatpush1.bf16.msra.mxu0 %v4354_v30  ;;  %v4444_v30 = vld [vmem:[#allocation5 + $0x198] ss:$48 sps:$4 sm:$0xff]  }
  0xe9   : > { %2789 = vmatpush1.bf16.msra.mxu1 %v4357_v31  ;;  %2749 = vmatprep.subr.bf16.mxu0 %v4362_v32  ;;  %v4447_v31 = vld [vmem:[#allocation5 + $0x798] ss:$48 sps:$4 sm:$0xff]   ;;  %v4452_v32 = vld [vmem:[#allocation5 + $0x13c] ss:$48 sps:$4 sm:$0xff]  }
  0xea   : > { %2790 = vmatprep.subr.bf16.mxu1 %v4365_v33  ;;  %v4455_v33 = vld [vmem:[#allocation5 + $0x73c] ss:$48 sps:$4 sm:$0xff]  }
  0xec   : > { %2750 = vmatpush1.bf16.msra.mxu0 %v4360_v34  ;;  %v4450_v34 = vld [vmem:[#allocation5 + $0x138] ss:$48 sps:$4 sm:$0xff]  }
  0xed   : > { %2791 = vmatpush1.bf16.msra.mxu1 %v4363_v35  ;;  %2751 = vmatprep.subr.bf16.mxu0 %v4368_v36  ;;  %v4453_v35 = vld [vmem:[#allocation5 + $0x738] ss:$48 sps:$4 sm:$0xff]   ;;  %v4458_v36 = vld [vmem:[#allocation5 + $0xdc] ss:$48 sps:$4 sm:$0xff]  }
  0xee   : > { %2792 = vmatprep.subr.bf16.mxu1 %v4371_v37  ;;  %v4461_v37 = vld [vmem:[#allocation5 + $0x6dc] ss:$48 sps:$4 sm:$0xff]  }
  0xf0   : > { %2752 = vmatpush1.bf16.msra.mxu0 %v4366_v38  ;;  %v4456_v38 = vld [vmem:[#allocation5 + $0xd8] ss:$48 sps:$4 sm:$0xff]  }
  0xf1   : > { %2793 = vmatpush1.bf16.msra.mxu1 %v4369_v39  ;;  %2753 = vmatprep.subr.bf16.mxu0 %v4374_v40  ;;  %v4459_v39 = vld [vmem:[#allocation5 + $0x6d8] ss:$48 sps:$4 sm:$0xff]   ;;  %v4464_v40 = vld [vmem:[#allocation5 + $0x7c] ss:$48 sps:$4 sm:$0xff]  }
  0xf2   : > { %2794 = vmatprep.subr.bf16.mxu1 %v4377_v41  ;;  %v4467_v41 = vld [vmem:[#allocation5 + $0x67c] ss:$48 sps:$4 sm:$0xff]  }
  0xf4   : > { %2754 = vmatpush1.bf16.msra.mxu0 %v4372_v42  ;;  %v4462_v42 = vld [vmem:[#allocation5 + $0x78] ss:$48 sps:$4 sm:$0xff]  }
  0xf5   : > { %2795 = vmatpush1.bf16.msra.mxu1 %v4375_v43  ;;  %2755 = vmatprep.subr.bf16.mxu0 %v4380_v44  ;;  %v4465_v43 = vld [vmem:[#allocation5 + $0x678] ss:$48 sps:$4 sm:$0xff]   ;;  %v4470_v44 = vld [vmem:[#allocation5 + $0x1c] ss:$48 sps:$4 sm:$0xff]  }
  0xf6   : > { %2796 = vmatprep.subr.bf16.mxu1 %v4383_v45  ;;  %v4473_v45 = vld [vmem:[#allocation5 + $0x61c] ss:$48 sps:$4 sm:$0xff]  }
  0xf8   : > { %2756 = vmatpush2.bf16.msra.mxu0 %v4378_v46  ;;  %v4468_v46 = vld [vmem:[#allocation5 + $0x18] ss:$48 sps:$4 sm:$0xff]  }
  0xf9   : > { %2797 = vmatpush2.bf16.msra.mxu1 %v4381_v47  ;;  %2757 = vmatprep.subr.bf16.mxu0 %v4386_v48  ;;  %v4471_v47 = vld [vmem:[#allocation5 + $0x618] ss:$48 sps:$4 sm:$0xff]   ;;  %v4476_v48 = vld [vmem:[#allocation5 + $0x5bc] ss:$48 sps:$4 sm:$0xff]  }
  0xfa   : > { %2798 = vmatprep.subr.bf16.mxu1 %v4389_v50  ;;  %v4479_v50 = vld [vmem:[#allocation5 + $0xbbc] ss:$48 sps:$4 sm:$0xff]  }
  0xfc   : > { %2758 = vmatpush2.bf16.msra.mxu0 %v4384_v51  ;;  %v4474_v51 = vld [vmem:[#allocation5 + $0x5b8] ss:$48 sps:$4 sm:$0xff]  }
  0xfd   : > { %2799 = vmatpush2.bf16.msra.mxu1 %v4387_v53  ;;  %2759 = vmatprep.subr.bf16.mxu0 %v4392_v54  ;;  %v4477_v53 = vld [vmem:[#allocation5 + $0xbb8] ss:$48 sps:$4 sm:$0xff]   ;;  %v4482_v54 = vld [vmem:[#allocation5 + $0x55c] ss:$48 sps:$4 sm:$0xff]  }
  0xfe   : > { %2800 = vmatprep.subr.bf16.mxu1 %v4395_v55  ;;  %v4485_v55 = vld [vmem:[#allocation5 + $0xb5c] ss:$48 sps:$4 sm:$0xff]  }
 0x100   : > { %2760 = vmatpush2.bf16.msra.mxu0 %v4390_v56  ;;  %v4480_v56 = vld [vmem:[#allocation5 + $0x558] ss:$48 sps:$4 sm:$0xff]  }
 0x101   : > { %2801 = vmatpush2.bf16.msra.mxu1 %v4393_v57  ;;  %2761 = vmatprep.subr.bf16.mxu0 %v4398_v58  ;;  %v4483_v57 = vld [vmem:[#allocation5 + $0xb58] ss:$48 sps:$4 sm:$0xff]   ;;  %v4488_v58 = vld [vmem:[#allocation5 + $0x4fc] ss:$48 sps:$4 sm:$0xff]  }
 0x102   : > { %2802 = vmatprep.subr.bf16.mxu1 %v4401_v59  ;;  %v4491_v59 = vld [vmem:[#allocation5 + $0xafc] ss:$48 sps:$4 sm:$0xff]  }
 0x104   : > { %2762 = vmatpush2.bf16.msra.mxu0 %v4396_v60  ;;  %v4486_v60 = vld [vmem:[#allocation5 + $0x4f8] ss:$48 sps:$4 sm:$0xff]  }
 0x105   : > { %2803 = vmatpush2.bf16.msra.mxu1 %v4399_v61  ;;  %2763 = vmatprep.subr.bf16.mxu0 %v4404_v62  ;;  %v4489_v61 = vld [vmem:[#allocation5 + $0xaf8] ss:$48 sps:$4 sm:$0xff]   ;;  %v4494_v62 = vld [vmem:[#allocation5 + $0x49c] ss:$48 sps:$4 sm:$0xff]  }
 0x106   : > { %2804 = vmatprep.subr.bf16.mxu1 %v4407_v63  ;;  %v4497_v63 = vld [vmem:[#allocation5 + $0xa9c] ss:$48 sps:$4 sm:$0xff]  }
 0x108   : > { %2764 = vmatpush2.bf16.msra.mxu0 %v4402_v0  ;;  %v4492_v0 = vld [vmem:[#allocation5 + $0x498] ss:$48 sps:$4 sm:$0xff]  }
 0x109   : > { %2805 = vmatpush2.bf16.msra.mxu1 %v4405_v1  ;;  %2765 = vmatprep.subr.bf16.mxu0 %v4410_v2  ;;  %v4495_v1 = vld [vmem:[#allocation5 + $0xa98] ss:$48 sps:$4 sm:$0xff]   ;;  %v4500_v2 = vld [vmem:[#allocation5 + $0x43c] ss:$48 sps:$4 sm:$0xff]  }
 0x10a   : > { %2806 = vmatprep.subr.bf16.mxu1 %v4413_v3  ;;  %v4503_v3 = vld [vmem:[#allocation5 + $0xa3c] ss:$48 sps:$4 sm:$0xff]  }
 0x10c   : > { %2766 = vmatpush2.bf16.msra.mxu0 %v4408_v4  ;;  %v4498_v4 = vld [vmem:[#allocation5 + $0x438] ss:$48 sps:$4 sm:$0xff]  }
 0x10d   : > { %2807 = vmatpush2.bf16.msra.mxu1 %v4411_v5  ;;  %2767 = vmatprep.subr.bf16.mxu0 %v4416_v6  ;;  %v4501_v5 = vld [vmem:[#allocation5 + $0xa38] ss:$48 sps:$4 sm:$0xff]   ;;  %v4506_v6 = vld [vmem:[#allocation5 + $0x3dc] ss:$48 sps:$4 sm:$0xff]  }
 0x10e   : > { %2808 = vmatprep.subr.bf16.mxu1 %v4419_v7  ;;  %v4509_v7 = vld [vmem:[#allocation5 + $0x9dc] ss:$48 sps:$4 sm:$0xff]  }
 0x110   : > { %2768 = vmatpush2.bf16.msra.mxu0 %v4414_v10  ;;  %v4504_v10 = vld [vmem:[#allocation5 + $0x3d8] ss:$48 sps:$4 sm:$0xff]  }
 0x111   : > { %2809 = vmatpush2.bf16.msra.mxu1 %v4417_v11  ;;  %2769 = vmatprep.subr.bf16.mxu0 %v4422_v12  ;;  %v4507_v11 = vld [vmem:[#allocation5 + $0x9d8] ss:$48 sps:$4 sm:$0xff]   ;;  %v4512_v12 = vld [vmem:[#allocation5 + $0x37c] ss:$48 sps:$4 sm:$0xff]  }
 0x112   : > { %2810 = vmatprep.subr.bf16.mxu1 %v4425_v13  ;;  %v4515_v13 = vld [vmem:[#allocation5 + $0x97c] ss:$48 sps:$4 sm:$0xff]  }
 0x114   : > { %2770 = vmatpush2.bf16.msra.mxu0 %v4420_v14  ;;  %v4510_v14 = vld [vmem:[#allocation5 + $0x378] ss:$48 sps:$4 sm:$0xff]  }
 0x115   : > { %2811 = vmatpush2.bf16.msra.mxu1 %v4423_v15  ;;  %2821 = vmatprep.subr.bf16.mxu0 %v4428_v16  ;;  %v4513_v15 = vld [vmem:[#allocation5 + $0x978] ss:$48 sps:$4 sm:$0xff]   ;;  %v4518_v16 = vld [vmem:[#allocation5 + $0x31c] ss:$48 sps:$4 sm:$0xff]  }
 0x116   : > { %2862 = vmatprep.subr.bf16.mxu1 %v4431_v17  ;;  %v4521_v17 = vld [vmem:[#allocation5 + $0x91c] ss:$48 sps:$4 sm:$0xff]  }
 0x117   : > { %2772 = vmatmul.mubr.bf16.vlgmr.msra.gmra.mxu0 %v5059_v8 }
 0x118   : > { %2813 = vmatmul.mubr.bf16.vlgmr.msra.gmra.mxu1 %v5061_v9  ;;  %2822 = vmatpush1.bf16.msra.mxu0 %v4426_v18  ;;  %v4516_v18 = vld [vmem:[#allocation5 + $0x318] ss:$48 sps:$4 sm:$0xff]  }
 0x119   : > { %2863 = vmatpush1.bf16.msra.mxu1 %v4429_v19  ;;  %2823 = vmatprep.subr.bf16.mxu0 %v4434_v20  ;;  %v4519_v19 = vld [vmem:[#allocation5 + $0x918] ss:$48 sps:$4 sm:$0xff]   ;;  %v4524_v20 = vld [vmem:[#allocation5 + $0x2c4] ss:$48 sps:$4 sm:$0xff]  }
 0x11a   : > { %2864 = vmatprep.subr.bf16.mxu1 %v4437_v21  ;;  %2853 = vmatprep.mubr.bf16.mxu0 %v5050_v49  ;;  %v4527_v21 = vld [vmem:[#allocation5 + $0x8c4] ss:$48 sps:$4 sm:$0xff]  }
 0x11b   : > { %2894 = vmatprep.mubr.bf16.mxu1 %v5053_v52 }
 0x11c   : > { %2824 = vmatpush1.bf16.msra.mxu0 %v4432_v22  ;;  %v4522_v22 = vld [vmem:[#allocation5 + $0x2c0] ss:$48 sps:$4 sm:$0xff]  }
 0x11d   : > { %2865 = vmatpush1.bf16.msra.mxu1 %v4435_v23  ;;  %2825 = vmatprep.subr.bf16.mxu0 %v4440_v24  ;;  %v4525_v23 = vld [vmem:[#allocation5 + $0x8c0] ss:$48 sps:$4 sm:$0xff]   ;;  %v4530_v24 = vld [vmem:[#allocation5 + $0x264] ss:$48 sps:$4 sm:$0xff]  }
 0x11e   : > { %2866 = vmatprep.subr.bf16.mxu1 %v4443_v25  ;;  %v4533_v25 = vld [vmem:[#allocation5 + $0x864] ss:$48 sps:$4 sm:$0xff]  }
 0x120   : > { %2826 = vmatpush1.bf16.msra.mxu0 %v4438_v26 }
 0x121   : > { %2867 = vmatpush1.bf16.msra.mxu1 %v4441_v27  ;;  %2827 = vmatprep.subr.bf16.mxu0 %v4446_v28 }
 0x122   : > { %2868 = vmatprep.subr.bf16.mxu1 %v4449_v29  ;;  %v4528_v29 = vld [vmem:[#allocation5 + $0x260] ss:$48 sps:$4 sm:$0xff]  }
 0x124   : > { %2828 = vmatpush1.bf16.msra.mxu0 %v4444_v30  ;;  %v4531_v30 = vld [vmem:[#allocation5 + $0x860] ss:$48 sps:$4 sm:$0xff]  }
 0x125   : > { %2869 = vmatpush1.bf16.msra.mxu1 %v4447_v31  ;;  %2829 = vmatprep.subr.bf16.mxu0 %v4452_v32 }
 0x126   : > { %2870 = vmatprep.subr.bf16.mxu1 %v4455_v33  ;;  %v4536_v33 = vld [vmem:[#allocation5 + $0x204] ss:$48 sps:$4 sm:$0xff]  }
 0x128   : > { %2830 = vmatpush1.bf16.msra.mxu0 %v4450_v34  ;;  %v4539_v34 = vld [vmem:[#allocation5 + $0x804] ss:$48 sps:$4 sm:$0xff]  }
 0x129   : > { %2871 = vmatpush1.bf16.msra.mxu1 %v4453_v35  ;;  %2831 = vmatprep.subr.bf16.mxu0 %v4458_v36 }
 0x12a   : > { %2872 = vmatprep.subr.bf16.mxu1 %v4461_v37 }
 0x12c   : > { %2832 = vmatpush1.bf16.msra.mxu0 %v4456_v38  ;;  %v4534_v38 = vld [vmem:[#allocation5 + $0x200] ss:$48 sps:$4 sm:$0xff]  }
 0x12d   : > { %2873 = vmatpush1.bf16.msra.mxu1 %v4459_v39  ;;  %2833 = vmatprep.subr.bf16.mxu0 %v4464_v40  ;;  %v4537_v39 = vld [vmem:[#allocation5 + $0x800] ss:$48 sps:$4 sm:$0xff]  }
 0x12e   : > { %2874 = vmatprep.subr.bf16.mxu1 %v4467_v41  ;;  %v4542_v41 = vld [vmem:[#allocation5 + $0x1a4] ss:$48 sps:$4 sm:$0xff]  }
 0x130   : > { %2834 = vmatpush1.bf16.msra.mxu0 %v4462_v42  ;;  %v4545_v42 = vld [vmem:[#allocation5 + $0x7a4] ss:$48 sps:$4 sm:$0xff]  }
 0x131   : > { %2875 = vmatpush1.bf16.msra.mxu1 %v4465_v43  ;;  %2835 = vmatprep.subr.bf16.mxu0 %v4470_v44  ;;  %v4540_v44 = vld [vmem:[#allocation5 + $0x1a0] ss:$48 sps:$4 sm:$0xff]  }
 0x132   : > { %2876 = vmatprep.subr.bf16.mxu1 %v4473_v45  ;;  %v4543_v45 = vld [vmem:[#allocation5 + $0x7a0] ss:$48 sps:$4 sm:$0xff]  }
 0x134   : > { %2836 = vmatpush1.bf16.msra.mxu0 %v4468_v46  ;;  %v4548_v46 = vld [vmem:[#allocation5 + $0x144] ss:$48 sps:$4 sm:$0xff]  }
 0x135   : > { %2877 = vmatpush1.bf16.msra.mxu1 %v4471_v47  ;;  %2837 = vmatprep.subr.bf16.mxu0 %v4476_v48  ;;  %v4551_v47 = vld [vmem:[#allocation5 + $0x744] ss:$48 sps:$4 sm:$0xff]   ;;  %v4546_v48 = vld [vmem:[#allocation5 + $0x140] ss:$48 sps:$4 sm:$0xff]  }
 0x136   : > { %2878 = vmatprep.subr.bf16.mxu1 %v4479_v50  ;;  %v4549_v50 = vld [vmem:[#allocation5 + $0x740] ss:$48 sps:$4 sm:$0xff]  }
 0x138   : > { %2838 = vmatpush2.bf16.msra.mxu0 %v4474_v51  ;;  %v4554_v51 = vld [vmem:[#allocation5 + $0xe4] ss:$48 sps:$4 sm:$0xff]  }
 0x139   : > { %2879 = vmatpush2.bf16.msra.mxu1 %v4477_v53  ;;  %2839 = vmatprep.subr.bf16.mxu0 %v4482_v54  ;;  %v4557_v53 = vld [vmem:[#allocation5 + $0x6e4] ss:$48 sps:$4 sm:$0xff]   ;;  %v4552_v54 = vld [vmem:[#allocation5 + $0xe0] ss:$48 sps:$4 sm:$0xff]  }
 0x13a   : > { %2880 = vmatprep.subr.bf16.mxu1 %v4485_v55  ;;  %v4555_v55 = vld [vmem:[#allocation5 + $0x6e0] ss:$48 sps:$4 sm:$0xff]  }
 0x13c   : > { %2840 = vmatpush2.bf16.msra.mxu0 %v4480_v56  ;;  %v4560_v56 = vld [vmem:[#allocation5 + $0x84] ss:$48 sps:$4 sm:$0xff]  }
 0x13d   : > { %2881 = vmatpush2.bf16.msra.mxu1 %v4483_v57  ;;  %2841 = vmatprep.subr.bf16.mxu0 %v4488_v58  ;;  %v4563_v57 = vld [vmem:[#allocation5 + $0x684] ss:$48 sps:$4 sm:$0xff]   ;;  %v4558_v58 = vld [vmem:[#allocation5 + $0x80] ss:$48 sps:$4 sm:$0xff]  }
 0x13e   : > { %2882 = vmatprep.subr.bf16.mxu1 %v4491_v59  ;;  %v4561_v59 = vld [vmem:[#allocation5 + $0x680] ss:$48 sps:$4 sm:$0xff]  }
 0x140   : > { %2842 = vmatpush2.bf16.msra.mxu0 %v4486_v60  ;;  %v4566_v60 = vld [vmem:[#allocation5 + $0x24] ss:$48 sps:$4 sm:$0xff]  }
 0x141   : > { %2883 = vmatpush2.bf16.msra.mxu1 %v4489_v61  ;;  %2843 = vmatprep.subr.bf16.mxu0 %v4494_v62  ;;  %v4569_v61 = vld [vmem:[#allocation5 + $0x624] ss:$48 sps:$4 sm:$0xff]   ;;  %v4564_v62 = vld [vmem:[#allocation5 + $0x20] ss:$48 sps:$4 sm:$0xff]  }
 0x142   : > { %2884 = vmatprep.subr.bf16.mxu1 %v4497_v63  ;;  %v4567_v63 = vld [vmem:[#allocation5 + $0x620] ss:$48 sps:$4 sm:$0xff]  }
 0x144   : > { %2844 = vmatpush2.bf16.msra.mxu0 %v4492_v0  ;;  %v4572_v0 = vld [vmem:[#allocation5 + $0x5c4] ss:$48 sps:$4 sm:$0xff]  }
 0x145   : > { %2885 = vmatpush2.bf16.msra.mxu1 %v4495_v1  ;;  %2845 = vmatprep.subr.bf16.mxu0 %v4500_v2  ;;  %v4575_v1 = vld [vmem:[#allocation5 + $0xbc4] ss:$48 sps:$4 sm:$0xff]   ;;  %v4570_v2 = vld [vmem:[#allocation5 + $0x5c0] ss:$48 sps:$4 sm:$0xff]  }
 0x146   : > { %2886 = vmatprep.subr.bf16.mxu1 %v4503_v3  ;;  %v4573_v3 = vld [vmem:[#allocation5 + $0xbc0] ss:$48 sps:$4 sm:$0xff]  }
 0x148   : > { %2846 = vmatpush2.bf16.msra.mxu0 %v4498_v4  ;;  %v4578_v4 = vld [vmem:[#allocation5 + $0x564] ss:$48 sps:$4 sm:$0xff]  }
 0x149   : > { %2887 = vmatpush2.bf16.msra.mxu1 %v4501_v5  ;;  %2847 = vmatprep.subr.bf16.mxu0 %v4506_v6  ;;  %v4581_v5 = vld [vmem:[#allocation5 + $0xb64] ss:$48 sps:$4 sm:$0xff]   ;;  %v4576_v6 = vld [vmem:[#allocation5 + $0x560] ss:$48 sps:$4 sm:$0xff]  }
 0x14a   : > { %2888 = vmatprep.subr.bf16.mxu1 %v4509_v7  ;;  %v4579_v7 = vld [vmem:[#allocation5 + $0xb60] ss:$48 sps:$4 sm:$0xff]  }
 0x14c   : > { %2848 = vmatpush2.bf16.msra.mxu0 %v4504_v10  ;;  %v4584_v10 = vld [vmem:[#allocation5 + $0x504] ss:$48 sps:$4 sm:$0xff]  }
 0x14d   : > { %2889 = vmatpush2.bf16.msra.mxu1 %v4507_v11  ;;  %2849 = vmatprep.subr.bf16.mxu0 %v4512_v12  ;;  %v4587_v11 = vld [vmem:[#allocation5 + $0xb04] ss:$48 sps:$4 sm:$0xff]   ;;  %v4582_v12 = vld [vmem:[#allocation5 + $0x500] ss:$48 sps:$4 sm:$0xff]  }
 0x14e   : > { %2890 = vmatprep.subr.bf16.mxu1 %v4515_v13  ;;  %v4585_v13 = vld [vmem:[#allocation5 + $0xb00] ss:$48 sps:$4 sm:$0xff]  }
 0x150   : > { %2850 = vmatpush2.bf16.msra.mxu0 %v4510_v14  ;;  %v4590_v14 = vld [vmem:[#allocation5 + $0x4a4] ss:$48 sps:$4 sm:$0xff]  }
 0x151   : > { %2891 = vmatpush2.bf16.msra.mxu1 %v4513_v15  ;;  %2851 = vmatprep.subr.bf16.mxu0 %v4518_v16  ;;  %v4593_v15 = vld [vmem:[#allocation5 + $0xaa4] ss:$48 sps:$4 sm:$0xff]   ;;  %v4588_v16 = vld [vmem:[#allocation5 + $0x4a0] ss:$48 sps:$4 sm:$0xff]  }
 0x152   : > { %2892 = vmatprep.subr.bf16.mxu1 %v4521_v17  ;;  %v4591_v17 = vld [vmem:[#allocation5 + $0xaa0] ss:$48 sps:$4 sm:$0xff]  }
 0x154   : > { %2852 = vmatpush2.bf16.msra.mxu0 %v4516_v18  ;;  %v4596_v18 = vld [vmem:[#allocation5 + $0x444] ss:$48 sps:$4 sm:$0xff]  }
 0x155   : > { %2893 = vmatpush2.bf16.msra.mxu1 %v4519_v19  ;;  %2903 = vmatprep.subr.bf16.mxu0 %v4524_v20  ;;  %v4599_v19 = vld [vmem:[#allocation5 + $0xa44] ss:$48 sps:$4 sm:$0xff]   ;;  %v4594_v20 = vld [vmem:[#allocation5 + $0x440] ss:$48 sps:$4 sm:$0xff]  }
 0x156   : > { %2944 = vmatprep.subr.bf16.mxu1 %v4527_v21  ;;  %v4597_v21 = vld [vmem:[#allocation5 + $0xa40] ss:$48 sps:$4 sm:$0xff]  }
 0x157   : > { %v2609_v26 = vpop.f32.mrf.mxu0  ;;  %2854 = vmatmul.mubr.bf16.vlgmr.msra.gmra.mxu0 %v5059_v8 }
 0x158   : > { %v2650_v27 = vpop.f32.mrf.mxu1  ;;  %2895 = vmatmul.mubr.bf16.vlgmr.msra.gmra.mxu1 %v5061_v9  ;;  %2904 = vmatpush1.bf16.msra.mxu0 %v4522_v22  ;;  %v4602_v22 = vld [vmem:[#allocation5 + $0x3e4] ss:$48 sps:$4 sm:$0xff]  }
 0x159   : > { %v5077_v28 = vadd.f32 %v2650_v27, %v2609_v26  ;;  %2945 = vmatpush1.bf16.msra.mxu1 %v4525_v23  ;;  %v2611_v31 = vpop.f32.mrf.mxu0  ;;  %2905 = vmatprep.subr.bf16.mxu0 %v4530_v24  ;;  %v4605_v23 = vld [vmem:[#allocation5 + $0x9e4] ss:$48 sps:$4 sm:$0xff]   ;;  %v4600_v24 = vld [vmem:[#allocation5 + $0x3e0] ss:$48 sps:$4 sm:$0xff]  }
 0x15a   : > { %v2652_v32 = vpop.f32.mrf.mxu1  ;;  %2946 = vmatprep.subr.bf16.mxu1 %v4533_v25  ;;  %2935 = vmatprep.mubr.bf16.mxu0 %v5050_v49  ;;  %v4603_v25 = vld [vmem:[#allocation5 + $0x9e0] ss:$48 sps:$4 sm:$0xff]   ;;  %v4608_v26 = vld [vmem:[#allocation5 + $0x384] ss:$48 sps:$4 sm:$0xff]  }
 0x15b   : > { %v5079_v35 = vadd.f32 %v2652_v32, %v2611_v31  ;;  %2976 = vmatprep.mubr.bf16.mxu1 %v5053_v52  ;;  %v2613_v36 = vpop.f32.mrf.mxu0  ;;  %v4611_v27 = vld [vmem:[#allocation5 + $0x984] ss:$48 sps:$4 sm:$0xff]  }
 0x15c   : > { %v2654_v37 = vpop.f32.mrf.mxu1  ;;  %2906 = vmatpush1.bf16.msra.mxu0 %v4528_v29  ;;  %v4606_v29 = vld [vmem:[#allocation5 + $0x380] ss:$48 sps:$4 sm:$0xff]   ;;  %v4614_v31 = vld [vmem:[#allocation5 + $0x324] ss:$48 sps:$4 sm:$0xff]   ;;  %v4620_v36 = vld [vmem:[#allocation5 + $0x2cc] ss:$48 sps:$4 sm:$0xff]  }
 0x15d   : > { %2947 = vmatpush1.bf16.msra.mxu1 %v4531_v30  ;;  %v2614_v40 = vpop.f32.mrf.mxu0  ;;  %2907 = vmatprep.subr.bf16.mxu0 %v4536_v33  ;;  %v4609_v30 = vld [vmem:[#allocation5 + $0x980] ss:$48 sps:$4 sm:$0xff]   ;;  %v4617_v32 = vld [vmem:[#allocation5 + $0x924] ss:$48 sps:$4 sm:$0xff]   ;;  %v4623_v37 = vld [vmem:[#allocation5 + $0x8cc] ss:$48 sps:$4 sm:$0xff]  }
 0x15e   : > { %2948 = vmatprep.subr.bf16.mxu1 %v4539_v34  ;;  %v2655_v43 = vpop.f32.mrf.mxu1  ;;  %v4612_v33 = vld [vmem:[#allocation5 + $0x320] ss:$48 sps:$4 sm:$0xff]   ;;  %v4626_v40 = vld [vmem:[#allocation5 + $0x26c] ss:$48 sps:$4 sm:$0xff]  }
 0x15f   : > { %v4615_v34 = vld [vmem:[#allocation5 + $0x920] ss:$48 sps:$4 sm:$0xff]  }
 0x160   : > { %2908 = vmatpush1.bf16.msra.mxu0 %v4534_v38  ;;  %v4618_v38 = vld [vmem:[#allocation5 + $0x2c8] ss:$48 sps:$4 sm:$0xff]  }
 0x161   : > { %2949 = vmatpush1.bf16.msra.mxu1 %v4537_v39  ;;  %2909 = vmatprep.subr.bf16.mxu0 %v4542_v41  ;;  %v4621_v39 = vld [vmem:[#allocation5 + $0x8c8] ss:$48 sps:$4 sm:$0xff]   ;;  %v4629_v41 = vld [vmem:[#allocation5 + $0x86c] ss:$48 sps:$4 sm:$0xff]  }
 0x162   : > { %2950 = vmatprep.subr.bf16.mxu1 %v4545_v42 }
 0x164   : > { %2910 = vmatpush1.bf16.msra.mxu0 %v4540_v44 }
 0x165   : > { %2951 = vmatpush1.bf16.msra.mxu1 %v4543_v45  ;;  %2911 = vmatprep.subr.bf16.mxu0 %v4548_v46  ;;  %v4624_v45 = vld [vmem:[#allocation5 + $0x268] ss:$48 sps:$4 sm:$0xff]  }
 0x166   : > { %2952 = vmatprep.subr.bf16.mxu1 %v4551_v47  ;;  %v4627_v46 = vld [vmem:[#allocation5 + $0x868] ss:$48 sps:$4 sm:$0xff]  }
 0x168   : > { %2912 = vmatpush1.bf16.msra.mxu0 %v4546_v48 }
 0x169   : > { %2953 = vmatpush1.bf16.msra.mxu1 %v4549_v50  ;;  %2913 = vmatprep.subr.bf16.mxu0 %v4554_v51  ;;  %v4632_v50 = vld [vmem:[#allocation5 + $0x20c] ss:$48 sps:$4 sm:$0xff]  }
 0x16a   : > { %2954 = vmatprep.subr.bf16.mxu1 %v4557_v53  ;;  %v4635_v51 = vld [vmem:[#allocation5 + $0x80c] ss:$48 sps:$4 sm:$0xff]  }
 0x16c   : > { %2914 = vmatpush1.bf16.msra.mxu0 %v4552_v54 }
 0x16d   : > { %2955 = vmatpush1.bf16.msra.mxu1 %v4555_v55  ;;  %2915 = vmatprep.subr.bf16.mxu0 %v4560_v56  ;;  %v4630_v55 = vld [vmem:[#allocation5 + $0x208] ss:$48 sps:$4 sm:$0xff]  }
 0x16e   : > { %2956 = vmatprep.subr.bf16.mxu1 %v4563_v57  ;;  %v4633_v56 = vld [vmem:[#allocation5 + $0x808] ss:$48 sps:$4 sm:$0xff]  }
 0x170   : > { %2916 = vmatpush1.bf16.msra.mxu0 %v4558_v58  ;;  %v4638_v58 = vld [vmem:[#allocation5 + $0x1ac] ss:$48 sps:$4 sm:$0xff]  }
 0x171   : > { %2957 = vmatpush1.bf16.msra.mxu1 %v4561_v59  ;;  %2917 = vmatprep.subr.bf16.mxu0 %v4566_v60  ;;  %v4641_v59 = vld [vmem:[#allocation5 + $0x7ac] ss:$48 sps:$4 sm:$0xff]  }
 0x172   : > { %2958 = vmatprep.subr.bf16.mxu1 %v4569_v61  ;;  %v4636_v61 = vld [vmem:[#allocation5 + $0x1a8] ss:$48 sps:$4 sm:$0xff]  }
 0x174   : > { %2918 = vmatpush1.bf16.msra.mxu0 %v4564_v62  ;;  %v4639_v62 = vld [vmem:[#allocation5 + $0x7a8] ss:$48 sps:$4 sm:$0xff]  }
 0x175   : > { %2959 = vmatpush1.bf16.msra.mxu1 %v4567_v63  ;;  %2919 = vmatprep.subr.bf16.mxu0 %v4572_v0  ;;  %v4642_v63 = vld [vmem:[#allocation5 + $0x148] ss:$48 sps:$4 sm:$0xff]  }
 0x176   : > { %2960 = vmatprep.subr.bf16.mxu1 %v4575_v1  ;;  %v4645_v0 = vld [vmem:[#allocation5 + $0x748] ss:$48 sps:$4 sm:$0xff]   ;;  %v4650_v1 = vld [vmem:[#allocation5 + $0xec] ss:$48 sps:$4 sm:$0xff]  }
 0x178   : > { %2920 = vmatpush2.bf16.msra.mxu0 %v4570_v2  ;;  %v4653_v2 = vld [vmem:[#allocation5 + $0x6ec] ss:$48 sps:$4 sm:$0xff]  }
 0x179   : > { %2961 = vmatpush2.bf16.msra.mxu1 %v4573_v3  ;;  %2921 = vmatprep.subr.bf16.mxu0 %v4578_v4  ;;  %v4648_v3 = vld [vmem:[#allocation5 + $0xe8] ss:$48 sps:$4 sm:$0xff]  }
 0x17a   : > { %2962 = vmatprep.subr.bf16.mxu1 %v4581_v5  ;;  %v4651_v4 = vld [vmem:[#allocation5 + $0x6e8] ss:$48 sps:$4 sm:$0xff]   ;;  %v4656_v5 = vld [vmem:[#allocation5 + $0x8c] ss:$48 sps:$4 sm:$0xff]  }
 0x17c   : > { %2922 = vmatpush2.bf16.msra.mxu0 %v4576_v6  ;;  %v4659_v6 = vld [vmem:[#allocation5 + $0x68c] ss:$48 sps:$4 sm:$0xff]  }
 0x17d   : > { %2963 = vmatpush2.bf16.msra.mxu1 %v4579_v7  ;;  %2923 = vmatprep.subr.bf16.mxu0 %v4584_v10  ;;  %v4654_v7 = vld [vmem:[#allocation5 + $0x88] ss:$48 sps:$4 sm:$0xff]  }
 0x17e   : > { %2964 = vmatprep.subr.bf16.mxu1 %v4587_v11  ;;  %v4657_v10 = vld [vmem:[#allocation5 + $0x688] ss:$48 sps:$4 sm:$0xff]   ;;  %v4662_v11 = vld [vmem:[#allocation5 + $0x2c] ss:$48 sps:$4 sm:$0xff]  }
 0x180   : > { %2924 = vmatpush2.bf16.msra.mxu0 %v4582_v12  ;;  %v4665_v12 = vld [vmem:[#allocation5 + $0x62c] ss:$48 sps:$4 sm:$0xff]  }
 0x181   : > { %2965 = vmatpush2.bf16.msra.mxu1 %v4585_v13  ;;  %2925 = vmatprep.subr.bf16.mxu0 %v4590_v14  ;;  %v4660_v13 = vld [vmem:[#allocation5 + $0x28] ss:$48 sps:$4 sm:$0xff]  }
 0x182   : > { %2966 = vmatprep.subr.bf16.mxu1 %v4593_v15  ;;  %v4663_v14 = vld [vmem:[#allocation5 + $0x628] ss:$48 sps:$4 sm:$0xff]   ;;  %v4668_v15 = vld [vmem:[#allocation5 + $0x5cc] ss:$48 sps:$4 sm:$0xff]  }
 0x184   : > { %2926 = vmatpush2.bf16.msra.mxu0 %v4588_v16  ;;  %v4671_v16 = vld [vmem:[#allocation5 + $0xbcc] ss:$48 sps:$4 sm:$0xff]  }
 0x185   : > { %2967 = vmatpush2.bf16.msra.mxu1 %v4591_v17  ;;  %2927 = vmatprep.subr.bf16.mxu0 %v4596_v18  ;;  %v4666_v17 = vld [vmem:[#allocation5 + $0x5c8] ss:$48 sps:$4 sm:$0xff]  }
 0x186   : > { %2968 = vmatprep.subr.bf16.mxu1 %v4599_v19  ;;  %v4669_v18 = vld [vmem:[#allocation5 + $0xbc8] ss:$48 sps:$4 sm:$0xff]   ;;  %v4674_v19 = vld [vmem:[#allocation5 + $0x56c] ss:$48 sps:$4 sm:$0xff]  }
 0x188   : > { %2928 = vmatpush2.bf16.msra.mxu0 %v4594_v20  ;;  %v4677_v20 = vld [vmem:[#allocation5 + $0xb6c] ss:$48 sps:$4 sm:$0xff]  }
 0x189   : > { %2969 = vmatpush2.bf16.msra.mxu1 %v4597_v21  ;;  %2929 = vmatprep.subr.bf16.mxu0 %v4602_v22  ;;  %v4672_v21 = vld [vmem:[#allocation5 + $0x568] ss:$48 sps:$4 sm:$0xff]  }
 0x18a   : > { %2970 = vmatprep.subr.bf16.mxu1 %v4605_v23  ;;  %v4675_v22 = vld [vmem:[#allocation5 + $0xb68] ss:$48 sps:$4 sm:$0xff]   ;;  %v4680_v23 = vld [vmem:[#allocation5 + $0x50c] ss:$48 sps:$4 sm:$0xff]  }
 0x18c   : > { %2930 = vmatpush2.bf16.msra.mxu0 %v4600_v24  ;;  %v4683_v24 = vld [vmem:[#allocation5 + $0xb0c] ss:$48 sps:$4 sm:$0xff]  }
 0x18d   : > { %2971 = vmatpush2.bf16.msra.mxu1 %v4603_v25  ;;  %2931 = vmatprep.subr.bf16.mxu0 %v4608_v26  ;;  %v4678_v25 = vld [vmem:[#allocation5 + $0x508] ss:$48 sps:$4 sm:$0xff]  }
 0x18e   : > { %2972 = vmatprep.subr.bf16.mxu1 %v4611_v27  ;;  %v4681_v26 = vld [vmem:[#allocation5 + $0xb08] ss:$48 sps:$4 sm:$0xff]   ;;  %v4686_v27 = vld [vmem:[#allocation5 + $0x4ac] ss:$48 sps:$4 sm:$0xff]  }
 0x190   : > { %2932 = vmatpush2.bf16.msra.mxu0 %v4606_v29  ;;  %v4689_v29 = vld [vmem:[#allocation5 + $0xaac] ss:$48 sps:$4 sm:$0xff]  }
 0x191   : > { %2973 = vmatpush2.bf16.msra.mxu1 %v4609_v30  ;;  %2933 = vmatprep.subr.bf16.mxu0 %v4614_v31  ;;  %v4684_v30 = vld [vmem:[#allocation5 + $0x4a8] ss:$48 sps:$4 sm:$0xff]  }
 0x192   : > { %2974 = vmatprep.subr.bf16.mxu1 %v4617_v32  ;;  %v4687_v31 = vld [vmem:[#allocation5 + $0xaa8] ss:$48 sps:$4 sm:$0xff]   ;;  %v4692_v32 = vld [vmem:[#allocation5 + $0x44c] ss:$48 sps:$4 sm:$0xff]  }
 0x194   : > { %2934 = vmatpush2.bf16.msra.mxu0 %v4612_v33  ;;  %v4695_v33 = vld [vmem:[#allocation5 + $0xa4c] ss:$48 sps:$4 sm:$0xff]  }
 0x195   : > { %2975 = vmatpush2.bf16.msra.mxu1 %v4615_v34  ;;  %2985 = vmatprep.subr.bf16.mxu0 %v4620_v36  ;;  %v4690_v34 = vld [vmem:[#allocation5 + $0x448] ss:$48 sps:$4 sm:$0xff]  }
 0x196   : > { %3026 = vmatprep.subr.bf16.mxu1 %v4623_v37  ;;  %v4693_v36 = vld [vmem:[#allocation5 + $0xa48] ss:$48 sps:$4 sm:$0xff]   ;;  %v4698_v37 = vld [vmem:[#allocation5 + $0x3ec] ss:$48 sps:$4 sm:$0xff]  }
 0x197   : > { %v2691_v42 = vpop.f32.mrf.mxu0  ;;  %2936 = vmatmul.mubr.bf16.vlgmr.msra.gmra.mxu0 %v5059_v8 }
 0x198   : > { %v2732_v43 = vpop.f32.mrf.mxu1  ;;  %2977 = vmatmul.mubr.bf16.vlgmr.msra.gmra.mxu1 %v5061_v9  ;;  %2986 = vmatpush1.bf16.msra.mxu0 %v4618_v38  ;;  %v4701_v38 = vld [vmem:[#allocation5 + $0x9ec] ss:$48 sps:$4 sm:$0xff]  }
 0x199   : > { %v5085_v44 = vadd.f32 %v2732_v43, %v2691_v42  ;;  %3027 = vmatpush1.bf16.msra.mxu1 %v4621_v39  ;;  %v5087_v47 = vpop.f32.mrf.mxu0  ;;  %2987 = vmatprep.subr.bf16.mxu0 %v4626_v40  ;;  %v4696_v39 = vld [vmem:[#allocation5 + $0x3e8] ss:$48 sps:$4 sm:$0xff]   ;;  %v4707_v42 = vld [vmem:[#allocation5 + $0x98c] ss:$48 sps:$4 sm:$0xff]  }
 0x19a   : > { %v5089_v48 = vpop.f32.mrf.mxu1  ;;  %3028 = vmatprep.subr.bf16.mxu1 %v4629_v41  ;;  %3017 = vmatprep.mubr.bf16.mxu0 %v5050_v49  ;;  %v4644_v49 = vld [vmem:[#allocation5 + $0x14c] ss:$48 sps:$4 sm:$0xff]   ;;  %v4699_v40 = vld [vmem:[#allocation5 + $0x9e8] ss:$48 sps:$4 sm:$0xff]  }
 0x19b   : > { %3058 = vmatprep.mubr.bf16.mxu1 %v5053_v52  ;;  %v2695_v53 = vpop.f32.mrf.mxu0  ;;  %v4647_v52 = vld [vmem:[#allocation5 + $0x74c] ss:$48 sps:$4 sm:$0xff]   ;;  %v4702_v43 = vld [vmem:[#allocation5 + $0x388] ss:$48 sps:$4 sm:$0xff]  }
 0x19c   : > { %v2736_v54 = vpop.f32.mrf.mxu1  ;;  %2988 = vmatpush1.bf16.msra.mxu0 %v4624_v45  ;;  %v4704_v41 = vld [vmem:[#allocation5 + $0x38c] ss:$48 sps:$4 sm:$0xff]   ;;  %v4705_v45 = vld [vmem:[#allocation5 + $0x988] ss:$48 sps:$4 sm:$0xff]  }
 0x19d   : > { %3029 = vmatpush1.bf16.msra.mxu1 %v4627_v46  ;;  %v2696_v57 = vpop.f32.mrf.mxu0  ;;  %2989 = vmatprep.subr.bf16.mxu0 %v4632_v50  ;;  %v4710_v46 = vld [vmem:[#allocation5 + $0x32c] ss:$48 sps:$4 sm:$0xff]   ;;  %v4711_v53 = vld [vmem:[#allocation5 + $0x928] ss:$48 sps:$4 sm:$0xff]   ;;  %v4716_v54 = vld [vmem:[#allocation7 + $0x4] ss:$16 sps:$4 sm:$0xff]  }
 0x19e   : > { %3030 = vmatprep.subr.bf16.mxu1 %v4635_v51  ;;  %v2737_v60 = vpop.f32.mrf.mxu1  ;;  %v4713_v50 = vld [vmem:[#allocation5 + $0x92c] ss:$48 sps:$4 sm:$0xff]   ;;  %v4708_v51 = vld [vmem:[#allocation5 + $0x328] ss:$48 sps:$4 sm:$0xff]  }
 0x19f   : > { %v4889_v60 = vmov 0  }
 0x1a0   : > { %2990 = vmatpush1.bf16.msra.mxu0 %v4630_v55  ;;  %v2735_v55 = vadd.f32 %v5089_v48, %v5087_v47  ;;  %v269_v47 = vld [vmem:[%s259_s8] sm:$0xff] }
 0x1a1   : > { %3031 = vmatpush1.bf16.msra.mxu1 %v4633_v56  ;;  %2991 = vmatprep.subr.bf16.mxu0 %v4638_v58  ;;  %v4714_v56 = vld [vmem:[#allocation7] ss:$16 sps:$4 sm:$0xff]  }
 0x1a2   : > { %3032 = vmatprep.subr.bf16.mxu1 %v4641_v59  ;;  %v3180_v57 = vpack.c.bf16 %v2735_v55, %v2735_v55 }
 0x1a4   : > { %2992 = vmatpush1.bf16.msra.mxu0 %v4636_v61 }
 0x1a5   : > { %3033 = vmatpush1.bf16.msra.mxu1 %v4639_v62  ;;  %2993 = vmatprep.subr.bf16.mxu0 %v4644_v49 }
 0x1a6   : > { %3034 = vmatprep.subr.bf16.mxu1 %v4647_v52  ;;  %v270_v52 = vpack.c.bf16 %v269_v47, %v269_v47 }
 0x1a8   : > { %2994 = vmatpush1.bf16.msra.mxu0 %v4642_v63 }
 0x1a9   : > { %3035 = vmatpush1.bf16.msra.mxu1 %v4645_v0  ;;  %2995 = vmatprep.subr.bf16.mxu0 %v4650_v1 }
 0x1aa   : > { %3036 = vmatprep.subr.bf16.mxu1 %v4653_v2 }
 0x1ac   : > { %2996 = vmatpush1.bf16.msra.mxu0 %v4648_v3 }
 0x1ad   : > { %3037 = vmatpush1.bf16.msra.mxu1 %v4651_v4  ;;  %2997 = vmatprep.subr.bf16.mxu0 %v4656_v5  ;;  %v3177_v5 = vpack.c.bf16 %v5077_v28, %v5077_v28 }
 0x1ae   : > { %3038 = vmatprep.subr.bf16.mxu1 %v4659_v6 }
 0x1b0   : > { %2998 = vmatpush1.bf16.msra.mxu0 %v4654_v7 }
 0x1b1   : > { %3039 = vmatpush1.bf16.msra.mxu1 %v4657_v10  ;;  %2999 = vmatprep.subr.bf16.mxu0 %v4662_v11 }
 0x1b2   : > { %3040 = vmatprep.subr.bf16.mxu1 %v4665_v12 }
 0x1b4   : > { %3000 = vmatpush1.bf16.msra.mxu0 %v4660_v13 }
 0x1b5   : > { %3041 = vmatpush1.bf16.msra.mxu1 %v4663_v14  ;;  %3001 = vmatprep.subr.bf16.mxu0 %v4668_v15 }
 0x1b6   : > { %3042 = vmatprep.subr.bf16.mxu1 %v4671_v16 }
 0x1b8   : > { %3002 = vmatpush2.bf16.msra.mxu0 %v4666_v17  ;;  %v4719_v17 = vld [vmem:[#allocation7 + $0xc] ss:$16 sps:$4 sm:$0xff]  }
 0x1b9   : > { %3043 = vmatpush2.bf16.msra.mxu1 %v4669_v18  ;;  %3003 = vmatprep.subr.bf16.mxu0 %v4674_v19  ;;  %v4717_v18 = vld [vmem:[#allocation7 + $0x8] ss:$16 sps:$4 sm:$0xff]  }
 0x1ba   : > { %3044 = vmatprep.subr.bf16.mxu1 %v4677_v20 }
 0x1bc   : > { %3004 = vmatpush2.bf16.msra.mxu0 %v4672_v21 }
 0x1bd   : > { %3045 = vmatpush2.bf16.msra.mxu1 %v4675_v22  ;;  %3005 = vmatprep.subr.bf16.mxu0 %v4680_v23 }
 0x1be   : > { %3046 = vmatprep.subr.bf16.mxu1 %v4683_v24 }
 0x1c0   : > { %3006 = vmatpush2.bf16.msra.mxu0 %v4678_v25 }
 0x1c1   : > { %3047 = vmatpush2.bf16.msra.mxu1 %v4681_v26  ;;  %3007 = vmatprep.subr.bf16.mxu0 %v4686_v27 }
 0x1c2   : > { %3048 = vmatprep.subr.bf16.mxu1 %v4689_v29 }
 0x1c4   : > { %3008 = vmatpush2.bf16.msra.mxu0 %v4684_v30 }
 0x1c5   : > { %3049 = vmatpush2.bf16.msra.mxu1 %v4687_v31  ;;  %3009 = vmatprep.subr.bf16.mxu0 %v4692_v32 }
 0x1c6   : > { %3050 = vmatprep.subr.bf16.mxu1 %v4695_v33 }
 0x1c8   : > { %3010 = vmatpush2.bf16.msra.mxu0 %v4690_v34 }
 0x1c9   : > { %3051 = vmatpush2.bf16.msra.mxu1 %v4693_v36  ;;  %3011 = vmatprep.subr.bf16.mxu0 %v4698_v37 }
 0x1ca   : > { %3052 = vmatprep.subr.bf16.mxu1 %v4701_v38 }
 0x1cc   : > { %3012 = vmatpush2.bf16.msra.mxu0 %v4696_v39 }
 0x1cd   : > { %3053 = vmatpush2.bf16.msra.mxu1 %v4699_v40  ;;  %3013 = vmatprep.subr.bf16.mxu0 %v4704_v41 }
 0x1ce   : > { %3054 = vmatprep.subr.bf16.mxu1 %v4707_v42 }
 0x1d0   : > { %3014 = vmatpush2.bf16.msra.mxu0 %v4702_v43 }
 0x1d1   : > { %3055 = vmatpush2.bf16.msra.mxu1 %v4705_v45  ;;  %3015 = vmatprep.subr.bf16.mxu0 %v4710_v46 }
 0x1d2   : > { %3056 = vmatprep.subr.bf16.mxu1 %v4713_v50 }
 0x1d4   : > { %3016 = vmatpush2.bf16.msra.mxu0 %v4708_v51 }
 0x1d5   : > { %3057 = vmatpush2.bf16.msra.mxu1 %v4711_v53  ;;  %3109 = vmatprep.subr.bf16.mxu0 %v4716_v54 }
 0x1d6   : > { %3150 = vmatprep.subr.bf16.mxu1 %v4719_v17 }
 0x1d7   : > { %v2773_v58 = vpop.f32.mrf.mxu0  ;;  %3018 = vmatmul.mubr.bf16.vlgmr.msra.gmra.mxu0 %v5059_v8  ;;  %v3178_v8 = vpack.c.bf16 %v5079_v35, %v5079_v35 }
 0x1d8   : > { %v2814_v59 = vpop.f32.mrf.mxu1  ;;  %3059 = vmatmul.mubr.bf16.vlgmr.msra.gmra.mxu1 %v5061_v9  ;;  %3110 = vmatpush1.bf16.msra.mxu0 %v4714_v56  ;;  %v3179_v9 = vpack.c.bf16 %v5085_v44, %v5085_v44 }
 0x1d9   : > { %3127 = vmatprep.mubr.bf16.mxu0 %v4889_v60  ;;  %v2775_v48 = vpop.f32.mrf.mxu0  ;;  %3199 = vmatprep.subr.bf16.mxu0 %v3180_v57  ;;  %v2815_v2 = vadd.f32 %v2814_v59, %v2773_v58 }
 0x1da   : > { %v2816_v61 = vpop.f32.mrf.mxu1  ;;  %3168 = vmatprep.mubr.bf16.mxu1 %v4889_v60  ;;  %3151 = vmatpush1.bf16.msra.mxu1 %v4717_v18 }
 0x1db   : > { %v2817_v62 = vadd.f32 %v2816_v61, %v2775_v48  ;;  %v2777_v49 = vpop.f32.mrf.mxu0  ;;  %v3181_v4 = vpack.c.bf16 %v2815_v2, %v2815_v2 }
 0x1dc   : > { %v2818_v63 = vpop.f32.mrf.mxu1 }
 0x1dd   : > { %v2778_v0 = vpop.f32.mrf.mxu0  ;;  %v3182_v3 = vpack.c.bf16 %v2817_v62, %v2817_v62  ;;  %v3301_v6 = vsel %vm3299_vm1, %v3181_v4, 0 }
 0x1de   : > { %v2819_v1 = vpop.f32.mrf.mxu1 }
 0x1df   : > { %4045 = vmatmul.mubr.msk.bf16.vlgmr.msra.gmra.mxu0 %vm3091_vm0, %v270_v52 }
 0x1e0   : > { %3200 = vmatpush1.bf16.xpose.msra.mxu0 %v3179_v9  ;;  %3217 = vmatprep.mubr.bf16.mxu0 %v3178_v8 }
 0x1e1   : > { %4047 = vmatprep.subr.msk.bf16.mxu0 %vm3299_vm1, %v3182_v3  ;;  %4046 = vmatmul.mubr.msk.bf16.vlgmr.msra.gmra.mxu1 %vm3091_vm0, %v270_v52 }
 0x1e7   : > { %3218 = vmatmul.mubr.bf16.vlgmr.msra.gmra.mxu0 %v3177_v5 }
 0x1e8   : > { %3321 = vmatpush1.bf16.msra.mxu0 %v3301_v6  ;;  %3338 = vmatprep.mubr.bf16.mxu0 %v4889_v60 }
 0x217   : > { %v2855_v35 = vpop.f32.mrf.mxu0 }
 0x218   : > { %v2896_v44 = vpop.f32.mrf.mxu1 }
 0x219   : > { %v2897_v7 = vadd.f32 %v2896_v44, %v2855_v35  ;;  %v2857_v10 = vpop.f32.mrf.mxu0 }
 0x21a   : > { %v2898_v11 = vpop.f32.mrf.mxu1 }
 0x21b   : > { %v2899_v12 = vadd.f32 %v2898_v11, %v2857_v10  ;;  %v2859_v13 = vpop.f32.mrf.mxu0  ;;  %v3347_v48 = vpack.c.bf16 %v2897_v7, %v2897_v7 }
 0x21c   : > { %v2900_v14 = vpop.f32.mrf.mxu1 }
 0x21d   : > { %v2860_v15 = vpop.f32.mrf.mxu0  ;;  %v3348_v54 = vpack.c.bf16 %v2899_v12, %v2899_v12 }
 0x21e   : > { %v2901_v16 = vpop.f32.mrf.mxu1 }
 0x257   : > { %v2937_v28 = vpop.f32.mrf.mxu0 }
 0x258   : > { %v2978_v19 = vpop.f32.mrf.mxu1 }
 0x259   : > { %v2979_v20 = vadd.f32 %v2978_v19, %v2937_v28  ;;  %v2939_v21 = vpop.f32.mrf.mxu0 }
 0x25a   : > { %v2980_v22 = vpop.f32.mrf.mxu1 }
 0x25b   : > { %v2981_v23 = vadd.f32 %v2980_v22, %v2939_v21  ;;  %v2941_v24 = vpop.f32.mrf.mxu0  ;;  %v3349_v55 = vpack.c.bf16 %v2979_v20, %v2979_v20 }
 0x25c   : > { %v2982_v25 = vpop.f32.mrf.mxu1 }
 0x25d   : > { %v2942_v26 = vpop.f32.mrf.mxu0  ;;  %v3350_v43 = vpack.c.bf16 %v2981_v23, %v2981_v23 }
 0x25e   : > { %v2983_v27 = vpop.f32.mrf.mxu1 }
 0x297   : > { %v3019_v29 = vpop.f32.mrf.mxu0 }
 0x298   : > { %v3060_v30 = vpop.f32.mrf.mxu1 }
 0x299   : > { %v3021_v31 = vpop.f32.mrf.mxu0  ;;  %v3061_v57 = vadd.f32 %v3060_v30, %v3019_v29 }
 0x29a   : > { %v3062_v32 = vpop.f32.mrf.mxu1 }
 0x29b   : > { %v3023_v33 = vpop.f32.mrf.mxu0  ;;  %v3063_v50 = vadd.f32 %v3062_v32, %v3021_v31  ;;  %v3351_v47 = vpack.c.bf16 %v3061_v57, %v3061_v57 }
 0x29c   : > { %v3064_v34 = vpop.f32.mrf.mxu1 }
 0x29d   : > { %v3024_v36 = vpop.f32.mrf.mxu0  ;;  %v3352_v58 = vpack.c.bf16 %v3063_v50, %v3063_v50  ;;  %v3469_v61 = vsel %vm3299_vm1, %v3351_v47, 0 }
 0x29e   : > { %v3065_v37 = vpop.f32.mrf.mxu1 }
 0x29f   : > { %v3129_v38 = vpop.f32.mrf.mxu0 }
 0x2a0   : > { %v3183_v41 = vpack.c.bf16 %v3129_v38, %v3129_v38 }
 0x2a1   : > { %v3131_v39 = vpop.f32.mrf.mxu0  ;;  %v3170_v62 = vpop.f32.mrf.mxu1 }
 0x2a2   : > { %v3184_v40 = vpack.c.bf16 %v3131_v39, %v3131_v39 }
 0x2a3   : > { %v3133_v42 = vpop.f32.mrf.mxu0  ;;  %v3172_v49 = vpop.f32.mrf.mxu1 }
 0x2a4   : > { %3239 = vmatprep.subr.bf16.mxu1 %v3184_v40  ;;  %3257 = vmatprep.mubr.bf16.mxu1 %v3184_v40  ;;  %v3354_v52 = vpack.c.bf16 %v3172_v49, %v3172_v49  ;;  %v3353_v40 = vpack.c.bf16 %v3170_v62, %v3170_v62 }
 0x2a5   : > { %v3134_v45 = vpop.f32.mrf.mxu0  ;;  %3240 = vmatpush1.bf16.xpose.msra.mxu1 %v3183_v41  ;;  %v3174_v63 = vpop.f32.mrf.mxu1 }
 0x2a6   : > { %3369 = vmatprep.subr.bf16.mxu1 %v3350_v43  ;;  %3409 = vmatprep.subr.bf16.mxu0 %v3354_v52 }
 0x2a7   : > { %v3219_v46 = vpop.f32.mrf.mxu0  ;;  %v3175_v0 = vpop.f32.mrf.mxu1 }
 0x2a8   : > { %v3267_v51 = vsel %vm3266_vm2, %v3219_v46, -inf }
 0x2a9   : > { %3268 = vmax.xlane.f32.xlu0 %v3267_v51  ;;  %v3221_v53 = vpop.f32.mrf.mxu0  ;;  %v4728_v51 = vld [vmem:[%s5039_s12] sm:$0xff] }
 0x2ab   : > { %v3222_v56 = vpop.f32.mrf.mxu0 }
 0x2ac   : > { %3258 = vmatmul.mubr.bf16.vlgmr.msra.gmra.mxu1 %v3183_v41  ;;  %v4729_v56 = vld [vmem:[%s5039_s12 + $0x8] sm:$0xff] }
 0x2ad   : > { %v3223_v59 = vpop.f32.mrf.mxu0  ;;  %3370 = vmatpush1.bf16.xpose.msra.mxu1 %v3349_v55  ;;  %3387 = vmatprep.mubr.bf16.mxu1 %v3348_v54 }
 0x2ae   : > { %4049 = vmatprep.subr.msk.bf16.mxu1 %vm3299_vm1, %v3352_v58 }
 0x2b4   : > { %3388 = vmatmul.mubr.bf16.vlgmr.msra.gmra.mxu1 %v3347_v48 }
 0x2b5   : > { %3489 = vmatpush1.bf16.msra.mxu1 %v3469_v61  ;;  %3506 = vmatprep.mubr.bf16.mxu1 %v4889_v60 }
 0x332   : > { %v3269_v1 = vpop.xlane.xlu0 %3268 }
 0x333   : > { %v3270_v8 = vrot.slane %v3269_v1, 4 }
 0x335   : > { %v3271_v9 = vmax.f32 %v3269_v1, %v3270_v8 }
 0x337   : > { %v3272_v2 = vrot.slane %v3271_v9, 2 }
 0x339   : > { %v3273_v3 = vmax.f32 %v3271_v9, %v3272_v2 }
 0x33b   : > { %v3274_v4 = vrot.slane %v3273_v3, 1 }
 0x33d   : > { %v3275_v5 = vmax.f32 %v3273_v3, %v3274_v4 }
 0x33f   : > { %4058 = vpush %v3275_v5 }
 0x36c   : > { %v3259_v6 = vpop.f32.mrf.mxu1 }
 0x36d   : > { %v3265_v17 = vmax.f32 %v3259_v6, 0.0 }
 0x36e   : > { %v3261_v35 = vpop.f32.mrf.mxu1 }
 0x370   : > { %v3262_v44 = vpop.f32.mrf.mxu1  ;;  %s4059_s9 = spop %4058 }
 0x371   : > { %v3277_v7 = vstv %s4059_s9 }
 0x372   : > { %v3278_v60 = vsub.f32 %v3219_v46, %v3277_v7  ;;  %v3263_v10 = vpop.f32.mrf.mxu1 }
 0x374   : > { %v3279_v11 = vmul.f32 1.442695, %v3278_v60  ;;  %v3389_v12 = vpop.f32.mrf.mxu1 }
 0x375   : > { %v3436_v13 = vsel %vm3266_vm2, %v3389_v12, -inf }
 0x376   : > { %4720 = vpow2.f32 %v3279_v11  ;;  %3437 = vmax.xlane.f32.xlu1 %v3436_v13  ;;  %v3391_v14 = vpop.f32.mrf.mxu1  ;;  %v4730_v11 = vld [vmem:[%s5039_s12 + $0x10] sm:$0xff] }
 0x378   : > { %v3392_v15 = vpop.f32.mrf.mxu1 }
 0x379   : > { %v4731_v15 = vld [vmem:[%s5039_s12 + $0x18] sm:$0xff] }
 0x37a   : > { %v3393_v16 = vpop.f32.mrf.mxu1 }
 0x383   : > { %v4721_v18 = vpop.eup %4720 }
 0x384   : > { %v3281_v28 = vmul.f32 %v4721_v18, %v3265_v17 }
 0x386   : > { %v3282_v19 = vsel %vm3266_vm2, %v3281_v28, 0.0 }
 0x387   : > { %3283 = vadd.xlane.f32.xlu0 %v3282_v19 }
 0x3ff   : > { %v3438_v20 = vpop.xlane.xlu1 %3437 }
 0x400   : > { %v3439_v21 = vrot.slane %v3438_v20, 4 }
 0x402   : > { %v3440_v22 = vmax.f32 %v3438_v20, %v3439_v21 }
 0x404   : > { %v3441_v23 = vrot.slane %v3440_v22, 2 }
 0x406   : > { %v3442_v27 = vmax.f32 %v3440_v22, %v3441_v23 }
 0x408   : > { %v3443_v31 = vrot.slane %v3442_v27, 1 }
 0x40a   : > { %v3444_v34 = vmax.f32 %v3442_v27, %v3443_v31 }
 0x410   : > { %v3284_v24 = vpop.xlane.xlu0 %3283 }
 0x411   : > { %v3285_v25 = vrot.slane %v3284_v24, 4 }
 0x413   : > { %v3286_v26 = vadd.f32 %v3285_v25, %v3284_v24 }
 0x415   : > { %v3287_v29 = vrot.slane %v3286_v26, 2 }
 0x417   : > { %v3288_v30 = vadd.f32 %v3287_v29, %v3286_v26 }
 0x419   : > { %v3289_v32 = vrot.slane %v3288_v30, 1 }
 0x41b   : > { %v3290_v33 = vadd.f32 %v3289_v32, %v3288_v30 }
 0x41d   : > { %4060 = vpush %v3290_v33 }
 0x41e   : > { %4062 = vpush %v3444_v34 }
 0x44e   : > { %s4061_s14 = spop %4060 }
 0x44f   : > { %v3292_v36 = vstv %s4061_s14  ;;  %s4063_s20 = spop %4062 }
 0x450   : > { %4722 = vrcp.f32 %v3292_v36  ;;  %v3446_v41 = vstv %s4063_s20 }
 0x451   : > { %v3447_v42 = vsub.f32 %v3389_v12, %v3446_v41 }
 0x453   : > { %v3448_v43 = vmul.f32 1.442695, %v3447_v42 }
 0x455   : > { %4724 = vpow2.f32 %v3448_v43 }
 0x45d   : > { %v4723_v37 = vpop.eup %4722 }
 0x45e   : > { %v3294_v38 = vmul.f32 %v4723_v37, %v3281_v28 }
 0x460   : > { %v3295_v39 = vpack.c.bf16 %v3294_v38, %v3294_v38 }
 0x462   : > { %4048 = vmatmul.mubr.msk.bf16.vlgmr.msra.gmra.mxu0 %vm3266_vm2, %v3295_v39  ;;  %v4725_v48 = vpop.eup %4724 }
 0x463   : > { %3410 = vmatpush1.bf16.xpose.msra.mxu0 %v3353_v40  ;;  %3427 = vmatprep.mubr.bf16.mxu0 %v3354_v52 }
 0x46a   : > { %3428 = vmatmul.mubr.bf16.vlgmr.msra.gmra.mxu0 %v3353_v40 }
 0x522   : > { %v3340_v45 = vpop.f32.mrf.mxu0 }
 0x523   : > { %v3515_v46 = vmul.f32 0.1, %v3340_v45 }
 0x524   : > { %v3342_v50 = vpop.f32.mrf.mxu0 }
 0x525   : > { %v3517_v53 = vadd.f32 %v4728_v51, %v3515_v46  ;;  %v3516_v54 = vmul.f32 0.1, %v3342_v50 }
 0x526   : > { %v3344_v55 = vpop.f32.mrf.mxu0 }
 0x527   : > { %3519 = vst [vmem:[%s5125_s27] sm:$0xff] %v3517_v53  ;;  %v3518_v57 = vadd.f32 %v4729_v56, %v3516_v54 }
 0x528   : > { %v3345_v58 = vpop.f32.mrf.mxu0 }
 0x529   : > { %3520 = vst [vmem:[%s5125_s27 + $0x8] sm:$0xff] %v3518_v57 }
 0x52a   : > { %v3429_v59 = vpop.f32.mrf.mxu0 }
 0x52b   : > { %v3435_v47 = vmax.f32 %v3429_v59, 0.0 }
 0x52c   : > { %v3431_v61 = vpop.f32.mrf.mxu0 }
 0x52d   : > { %v3450_v62 = vmul.f32 %v4725_v48, %v3435_v47 }
 0x52e   : > { %v3432_v49 = vpop.f32.mrf.mxu0 }
 0x52f   : > { %v3451_v52 = vsel %vm3266_vm2, %v3450_v62, 0.0 }
 0x530   : > { %3452 = vadd.xlane.f32.xlu1 %v3451_v52  ;;  %v3433_v63 = vpop.f32.mrf.mxu0 }
 0x5b9   : > { %v3453_v0 = vpop.xlane.xlu1 %3452 }
 0x5ba   : > { %v3454_v1 = vrot.slane %v3453_v0, 4 }
 0x5bc   : > { %v3455_v8 = vadd.f32 %v3454_v1, %v3453_v0 }
 0x5be   : > { %v3456_v9 = vrot.slane %v3455_v8, 2 }
 0x5c0   : > { %v3457_v2 = vadd.f32 %v3456_v9, %v3455_v8 }
 0x5c2   : > { %v3458_v3 = vrot.slane %v3457_v2, 1 }
 0x5c4   : > { %v3459_v4 = vadd.f32 %v3458_v3, %v3457_v2 }
 0x5c6   : > { %4064 = vpush %v3459_v4 }
 0x5f7   : > { %s4065_s28 = spop %4064 }
 0x5f8   : > { %v3461_v5 = vstv %s4065_s28 }
 0x5f9   : > { %4726 = vrcp.f32 %v3461_v5 }
 0x606   : > { %v4727_v6 = vpop.eup %4726 }
 0x607   : > { %v3463_v35 = vmul.f32 %v4727_v6, %v3450_v62 }
 0x609   : > { %v3464_v44 = vpack.c.bf16 %v3463_v35, %v3463_v35 }
 0x60b   : > { %4050 = vmatmul.mubr.msk.bf16.vlgmr.msra.gmra.mxu1 %vm3266_vm2, %v3464_v44 }
 0x6cb   : > { %v3508_v7 = vpop.f32.mrf.mxu1 }
 0x6cc   : > { %v3521_v60 = vmul.f32 0.1, %v3508_v7 }
 0x6cd   : > { %v3510_v10 = vpop.f32.mrf.mxu1 }
 0x6ce   : > { %v3523_v12 = vadd.f32 %v4730_v11, %v3521_v60  ;;  %v3522_v13 = vmul.f32 0.1, %v3510_v10 }
 0x6cf   : > { %v3512_v14 = vpop.f32.mrf.mxu1 }
 0x6d0   : > { %3525 = vst [vmem:[%s5125_s27 + $0x10] sm:$0xff] %v3523_v12  ;;  %v3524_v16 = vadd.f32 %v4731_v15, %v3522_v13 }
 0x6d1   : > { %v3513_v17 = vpop.f32.mrf.mxu1 }
 0x6d2   : > { %3526 = vst [vmem:[%s5125_s27 + $0x18] sm:$0xff] %v3524_v16 }
 0x6d3   : > { %4825 = shalt.err (!%p4822_p12)
}
 0x6d4   : > { %s4826_s12 = scalar_lea.hbm %s5140_s11, 512  ;;  %s4830_s9 = scalar_lea.hbm %s5181_s4, 2048 }
 0x6d5   : > { %p4827_p3 = scmp.ne.s32.totalorder %s5140_s11, %s4826_s12  ;;  %p4831_p8 = scmp.lt.s32.totalorder %s5140_s11, %s5181_s4 }
 0x6d6   : > { %p4832_p7 = scmp.lt.s32.totalorder %s4830_s9, %s4826_s12 }
 0x6d7   : > { %p4828_p0 = pnand %p4827_p3, %p5197_p1 }
 0x6d8   : > { %p4833_p10 = por %p4832_p7, %p4831_p8 }
 0x6d9   : > { %p4829_p4 = pneg %p4828_p0 }
 0x6db   : > { %p4834_p13 = pnand %p4833_p10, %p4829_p4 }
 0x6dd   : > { %4837 = shalt.err (!%p4834_p13)
}
 0x6de   : > { %4076 = dma.vmem_to_hbm [thread:$0]  (%p5197_p1), %s3543_s29, 512, %s5140_s11, %s3528_s21  }
 0x6df PF: > { %p4098_p2 = scmp.ge.s32.totalorder %s4880_s18, 2  ;;  %s3554_s27 = sand.u32 1, %s4868_s15  }
 0x6e0   : > { %p5198_p6 = scmp.ne.s32.totalorder %s5187_s22, 0  ;;  %s3555_s28 = scalar_lea.sflag [#allocation4], %s3554_s27 }
 0x6e2   : > { %p4090_p11 = pnand %p4098_p2, %p5198_p6 }
 0x6e4   : > { %p4091_p5 = pneg %p4090_p11 }
 0x6e6   : > { %4863 = dma.done.wait (%p4091_p5), %s3555_s28, 512  }
 0x6e7   : > { %4865 = vsyncadd (%p4091_p5), %s3555_s28, 4294966784  ;;  %p18_p9 = scmp.ge.s32.totalorder %s4987_s13, 6   ;;  %s5199_s15 = smov %s4872_s16 }
 0x6e8   : > { %s5200_s16 = smov %s4876_s17  ;;  %s5201_s17 = smov %s4996_s24 }
 0x6e9   : > { %s5202_s18 = smov %s4987_s13  ;;  %20 = sbr.rel (!%p18_p9) target bundleno = 6 (0x6), region = 92 }
 0x6ee   :  { %3560 = vsyncpa [#allocation3], 1 }
 0x6ef   :  { %3562 = vsyncpa [#allocation3 + $0x1], 1 }
 0x6f0   :  { %3563 = vsyncpa [#allocation6], 1 }
 0x6f1   :  { %3564 = vsyncpa [#allocation4], 1 }
 0x6f2   :  { %3566 = vsyncpa [#allocation4 + $0x1], 1 }

</bundles_post_ra>
